<compile_context>
chip_gen: v7x
topology: tpu7x:2x2x1
jax: 0.10.0
libtpu: 0.0.40
codegen_flags: <defaults>
</compile_context>

<pallas_src>
import math
from functools import partial

import numpy as np
import jax
import jax.numpy as jnp
from jax.experimental import pallas as pl
from jax.experimental.pallas import tpu as pltpu


WEIGHT_KEYS = ("wconv", "wqkv", "wproj", "waug1", "w1", "w2", "waug2", "vecs")

# Rows of the packed per-layer bias / LayerNorm table ("vecs").
ROW_CONVB, ROW_LN1G, ROW_LN1B, ROW_BIAS1, ROW_LN2G, ROW_LN2B, ROW_B1, ROW_BIAS2 = range(8)


# ----------------------------------------------------------------------------
# In-kernel helpers
# ----------------------------------------------------------------------------
def _layernorm(x, gamma, beta, eps=1e-5):
    mu = jnp.mean(x, axis=-1, keepdims=True)
    var = jnp.mean((x - mu) ** 2, axis=-1, keepdims=True)
    return (x - mu) * jax.lax.rsqrt(var + eps) * gamma + beta


# ----------------------------------------------------------------------------
# Fused stack kernel.  For each layer l (innermost, "arbitrary" grid axis):
#   Residual1:  x1 = Conv1d_k3_p1(x) + x
#               y1 = SelfAttn(LN(x1)) @ Wproj + x1 + x1 @ Waug1 + (bproj + baug1)
#   Residual2:  y2 = FFN(LN(y1))               + y1 + y1 @ Waug2 + (b2 + baug2)
# The activation is carried across layers in the VMEM scratch `act_ref`.
# ----------------------------------------------------------------------------
def fused_stack_kernel(x_ref, wconv_ref, wqkv_ref, wproj_ref, waug1_ref,
                       w1_ref, w2_ref, waug2_ref, vecs_ref,
                       o_ref, act_ref, *, num_heads, block_b, seq, dim, mlp):
    l = pl.program_id(1)
    num_layers = pl.num_programs(1)
    H, Bt, N, C = num_heads, block_b, seq, dim
    hd = C // H
    R = Bt * N                                    # rows in the dense (rows, C) layout
    bf16 = jnp.bfloat16
    f32 = jnp.float32

    # ---- load the input into the layer-carry scratch on the first layer ---------
    @pl.when(l == 0)
    def _():
        act_ref[...] = x_ref[...].reshape(R, C).astype(f32)

    x = act_ref[...]                              # (R, C) f32

    # ---- packed per-layer row-vector params (single DMA'd table) ----------------
    vecs = vecs_ref[0]                            # (8, max(C, mlp)) f32
    convb = vecs[ROW_CONVB:ROW_CONVB + 1, :C]
    g1    = vecs[ROW_LN1G:ROW_LN1G + 1, :C]
    be1   = vecs[ROW_LN1B:ROW_LN1B + 1, :C]
    bias1 = vecs[ROW_BIAS1:ROW_BIAS1 + 1, :C]     # bproj + baug1 (folded host-side)
    g2    = vecs[ROW_LN2G:ROW_LN2G + 1, :C]
    be2   = vecs[ROW_LN2B:ROW_LN2B + 1, :C]
    b1    = vecs[ROW_B1:ROW_B1 + 1, :mlp]
    bias2 = vecs[ROW_BIAS2:ROW_BIAS2 + 1, :C]     # b2 + baug2 (folded host-side)

    # ---- Conv1d(dim, dim, k=3, padding=1) along the sequence axis ----------------
    # y[n] = b + W0 x[n-1] + W1 x[n] + W2 x[n+1]; all taps in ONE (C, 3C) matmul,
    # then +/-1 sequence shifts via roll + an iota row mask (zero at sequence edges,
    # and the mask also kills any cross-batch-row leakage when Bt > 1).
    taps = jnp.dot(x.astype(bf16), wconv_ref[0], preferred_element_type=f32)  # (R,3C)
    t0 = taps[:, 0 * C:1 * C]
    t1 = taps[:, 1 * C:2 * C]
    t2 = taps[:, 2 * C:3 * C]
    pos = jax.lax.broadcasted_iota(jnp.int32, (Bt, N, C), 1).reshape(R, C)
    t0s = jnp.where(pos == 0,     0.0, jnp.roll(t0,  1, axis=0))   # -> t0[n-1]
    t2s = jnp.where(pos == N - 1, 0.0, jnp.roll(t2, -1, axis=0))   # -> t2[n+1]
    x1 = x + t1 + t0s + t2s + convb

    # ---- PreNormDrop(SelfAttention): merged QKV, head-batched scores -------------
    xn1 = _layernorm(x1, g1, be1)
    qkv = jnp.dot(xn1.astype(bf16), wqkv_ref[0],
                  preferred_element_type=f32)     # (R, 3C); Q cols pre-scaled 1/sqrt(hd)

    def split_heads(off):
        return jnp.stack(
            [qkv[bt * N:(bt + 1) * N, off + h * hd: off + (h + 1) * hd]
             for bt in range(Bt) for h in range(H)], axis=0)        # (Bt*H, N, hd)

    q = split_heads(0)
    k = split_heads(C)
    v = split_heads(2 * C)
    s = jnp.einsum('bqd,bkd->bqk', q.astype(bf16), k.astype(bf16),
                   preferred_element_type=f32)                      # (Bt*H, N, N)
    s = s - jnp.max(s, axis=-1, keepdims=True)
    e = jnp.exp(s)
    p = e * pl.reciprocal(jnp.sum(e, axis=-1, keepdims=True), approx=True)
    ctx = jnp.einsum('bqk,bkd->bqd', p.astype(bf16), v.astype(bf16),
                     preferred_element_type=f32)                    # (Bt*H, N, hd)
    # merge heads back to (R, C) with lane concats, then ONE (C, C) projection
    ctx_m = jnp.concatenate(
        [jnp.concatenate([ctx[bt * H + h] for h in range(H)], axis=-1)
         for bt in range(Bt)], axis=0)                              # (R, C)
    attn = jnp.dot(ctx_m.astype(bf16), wproj_ref[0], preferred_element_type=f32)

    # Residual1: fn(x1) + x1 + Circulant(x1); identity residual kept exact in f32.
    y1 = attn + x1 + bias1 + jnp.dot(x1.astype(bf16), waug1_ref[0],
                                     preferred_element_type=f32)

    # ---- Residual2: PreNorm(FeedForward) + residual + circulant ------------------
    xn2 = _layernorm(y1, g2, be2)
    h1 = jnp.dot(xn2.astype(bf16), w1_ref[0], preferred_element_type=f32) + b1
    h1 = 0.5 * h1 * (1.0 + jax.lax.erf(h1 * (1.0 / math.sqrt(2.0))))  # exact erf GELU
    ff = jnp.dot(h1.astype(bf16), w2_ref[0], preferred_element_type=f32)
    y2 = ff + y1 + bias2 + jnp.dot(y1.astype(bf16), waug2_ref[0],
                                   preferred_element_type=f32)

    # ---- carry to next layer; write HBM only once per batch block ----------------
    act_ref[...] = y2

    @pl.when(l == num_layers - 1)
    def _():
        o_ref[...] = y2.reshape(o_ref.shape).astype(o_ref.dtype)


# ----------------------------------------------------------------------------
# Single pallas_call for the whole stack: grid = (B // block_b, L).
# Batch axis "parallel" (megacore), layer axis "arbitrary" (VMEM carry).
# ----------------------------------------------------------------------------
def stack_params(layer_params):
    return {k: jnp.stack([p[k] for p in layer_params], axis=0) for k in WEIGHT_KEYS}


def transformer_forward(x, stacked, num_heads, block_b=1):
    B, N, C = x.shape
    assert B % block_b == 0 and C % num_heads == 0
    L = stacked["wqkv"].shape[0]
    mlp = stacked["w1"].shape[-1]
    nb = B // block_b

    def wspec(per_layer_shape):
        nd = len(per_layer_shape)
        return pl.BlockSpec((1,) + per_layer_shape,
                            lambda b, l, _nd=nd: (l,) + (0,) * _nd)

    in_specs = [pl.BlockSpec((block_b, N, C), lambda b, l: (b, 0, 0))]
    in_specs += [wspec(stacked[k].shape[1:]) for k in WEIGHT_KEYS]

    kernel = partial(fused_stack_kernel, num_heads=num_heads, block_b=block_b,
                     seq=N, dim=C, mlp=mlp)

    return pl.pallas_call(
        kernel,
        out_shape=jax.ShapeDtypeStruct((B, N, C), x.dtype),
        grid=(nb, L),
        in_specs=in_specs,
        out_specs=pl.BlockSpec((block_b, N, C), lambda b, l: (b, 0, 0)),
        scratch_shapes=[pltpu.VMEM((block_b * N, C), jnp.float32)],
        compiler_params=pltpu.CompilerParams(
            dimension_semantics=("parallel", "arbitrary")),
    )(x, *[stacked[k] for k in WEIGHT_KEYS])


# ----------------------------------------------------------------------------
# Deterministic parameter construction (synthetic weights, no checkpoint)
# ----------------------------------------------------------------------------
def _uniform(key, shape, bound):
    return jax.random.uniform(key, shape, jnp.float32, -bound, bound)


def make_circulant_linear(key, in_features, out_features, num_cir=4):
    """Materialize the Circulant_Linear dense weight: weight = weight_list[index_matrix]."""
    min_f = min(in_features, out_features)
    num_cir_in = num_cir * in_features // min_f
    num_cir_out = num_cir * out_features // min_f
    assert min_f % num_cir == 0
    fea_block = min_f // num_cir
    k1, k2 = jax.random.split(key)
    bound = 1.0 / math.sqrt(in_features)
    weight_list = _uniform(k1, (num_cir_out * num_cir_in * fea_block,), bound)
    # scipy.linalg.circulant(range(n))[i, j] == (i - j) % n
    blk = (np.arange(fea_block)[:, None] - np.arange(fea_block)[None, :]) % fea_block
    rows = []
    for ib in range(num_cir_out):
        cols = [blk + (ib * num_cir_in + jb) * fea_block for jb in range(num_cir_in)]
        rows.append(np.concatenate(cols, axis=1))
    index_matrix = np.concatenate(rows, axis=0)                 # (out, in)
    weight = weight_list[index_matrix]                          # (out, in)
    bias = _uniform(k2, (out_features,), bound)
    return weight.T, bias                                       # stored (in, out), (out,)


def init_layer(key, dim, heads, mlp_dim, num_cir=4):
    keys = jax.random.split(key, 11)
    C = dim
    hd = C // heads
    b_lin = 1.0 / math.sqrt(C)
    b_conv = 1.0 / math.sqrt(C * 3)
    b_mlp = 1.0 / math.sqrt(mlp_dim)

    # --- Residual1 ---
    conv_w = _uniform(keys[0], (C, C, 3), b_conv)               # (out, in, k) like PyTorch
    # Fused conv taps: columns [W0^T | W1^T | W2^T]  ->  (in, 3*out)
    wconv = jnp.concatenate([conv_w[:, :, kk].T for kk in range(3)], axis=1)
    convb = _uniform(keys[1], (C,), b_conv)
    wqkv = _uniform(keys[2], (C, 3 * C), b_lin)                 # merged [Q | K | V], qkv_bias=False
    wqkv = wqkv.at[:, :C].multiply(1.0 / math.sqrt(hd))         # fold attention scale into Q
    wproj = _uniform(keys[3], (C, C), b_lin)                    # merged-head output projection
    bproj = _uniform(keys[4], (C,), b_lin)
    waug1, baug1 = make_circulant_linear(keys[5], C, C, num_cir)

    # --- Residual2 ---
    w1 = _uniform(keys[6], (C, mlp_dim), b_lin)                 # stored (in, out)
    b1 = _uniform(keys[7], (mlp_dim,), b_lin)
    w2 = _uniform(keys[8], (mlp_dim, C), b_mlp)
    b2 = _uniform(keys[9], (C,), b_mlp)
    waug2, baug2 = make_circulant_linear(keys[10], C, C, num_cir)

    # --- pack all row-vector params into one (8, max(C, mlp)) f32 table ---
    vw = max(C, mlp_dim)
    vecs = jnp.zeros((8, vw), jnp.float32)
    vecs = vecs.at[ROW_CONVB, :C].set(convb)
    vecs = vecs.at[ROW_LN1G, :C].set(jnp.ones((C,), jnp.float32))
    vecs = vecs.at[ROW_LN1B, :C].set(jnp.zeros((C,), jnp.float32))
    vecs = vecs.at[ROW_BIAS1, :C].set(bproj + baug1)            # exact f32 host-side fold
    vecs = vecs.at[ROW_LN2G, :C].set(jnp.ones((C,), jnp.float32))
    vecs = vecs.at[ROW_LN2B, :C].set(jnp.zeros((C,), jnp.float32))
    vecs = vecs.at[ROW_B1, :mlp_dim].set(b1)
    vecs = vecs.at[ROW_BIAS2, :C].set(b2 + baug2)

    return {
        "wconv": wconv.astype(jnp.bfloat16),
        "wqkv":  wqkv.astype(jnp.bfloat16),
        "wproj": wproj.astype(jnp.bfloat16),
        "waug1": waug1.astype(jnp.bfloat16),                    # no +I fold: residual stays f32
        "w1":    w1.astype(jnp.bfloat16),
        "w2":    w2.astype(jnp.bfloat16),
        "waug2": waug2.astype(jnp.bfloat16),
        "vecs":  vecs,
    }


if __name__ == "__main__":
    key = jax.random.PRNGKey(0)
    B, N, dim, heads, mlp_dim, depth = 2, 8, 32, 4, 64, 2

    k_x, k_p = jax.random.split(key)
    x = jax.random.normal(k_x, (B, N, dim), jnp.float32)
    layer_keys = jax.random.split(k_p, depth)
    params = [init_layer(k, dim, heads, mlp_dim) for k in layer_keys]
    stacked = stack_params(params)

    # block_b=1 keeps >=2 steps on the "parallel" batch axis (both v7x TCs busy);
    # raise block_b at larger batch sizes to fill MXU sublanes.
    out = jax.block_until_ready(transformer_forward(x, stacked, heads, block_b=1))
    assert out.shape == (B, N, dim) and out.dtype == jnp.float32
    assert bool(jnp.all(jnp.isfinite(out)))
    print("KERNEL_OK")
</pallas_src>

<mosaic_0001>
module attributes {stable_mosaic.version = 11 : i64} {
  func.func @fused_stack_kernel(%arg0: i32, %arg1: i32, %arg2: memref<1x8x32xf32, #tpu.memory_space<vmem>>, %arg3: memref<1x32x96xbf16, #tpu.memory_space<vmem>>, %arg4: memref<1x32x96xbf16, #tpu.memory_space<vmem>>, %arg5: memref<1x32x32xbf16, #tpu.memory_space<vmem>>, %arg6: memref<1x32x32xbf16, #tpu.memory_space<vmem>>, %arg7: memref<1x32x64xbf16, #tpu.memory_space<vmem>>, %arg8: memref<1x64x32xbf16, #tpu.memory_space<vmem>>, %arg9: memref<1x32x32xbf16, #tpu.memory_space<vmem>>, %arg10: memref<1x8x64xf32, #tpu.memory_space<vmem>>, %arg11: memref<1x8x32xf32, #tpu.memory_space<vmem>>, %arg12: memref<8x32xf32, #tpu.memory_space<vmem>>) attributes {dimension_semantics = [#tpu.dimension_semantics<parallel>, #tpu.dimension_semantics<arbitrary>], iteration_bounds = array<i64: 2, 2>, scalar_prefetch = 0 : i64, scratch_operands = 1 : i64, tpu.core_type = #tpu.core_type<tc>, window_params = [{transform_indices = @transform_0, window_bounds = array<i64: 1, 8, 32>}, {transform_indices = @transform_1, window_bounds = array<i64: 1, 32, 96>}, {transform_indices = @transform_2, window_bounds = array<i64: 1, 32, 96>}, {transform_indices = @transform_3, window_bounds = array<i64: 1, 32, 32>}, {transform_indices = @transform_4, window_bounds = array<i64: 1, 32, 32>}, {transform_indices = @transform_5, window_bounds = array<i64: 1, 32, 64>}, {transform_indices = @transform_6, window_bounds = array<i64: 1, 64, 32>}, {transform_indices = @transform_7, window_bounds = array<i64: 1, 32, 32>}, {transform_indices = @transform_8, window_bounds = array<i64: 1, 8, 64>}, {transform_indices = @transform_9, window_bounds = array<i64: 1, 8, 32>}]} {
    %c0_i32 = arith.constant 0 : i32
    %0 = arith.cmpi eq, %arg1, %c0_i32 : i32
    %1 = arith.extui %0 : i1 to i32
    %c0_i32_0 = arith.constant 0 : i32
    %2 = arith.cmpi ne, %1, %c0_i32_0 : i32
    scf.if %2 {
      %c0_55 = arith.constant 0 : index
      %c0_56 = arith.constant 0 : index
      %c0_57 = arith.constant 0 : index
      %184 = vector.load %arg2[%c0_55, %c0_56, %c0_57] : memref<1x8x32xf32, #tpu.memory_space<vmem>>, vector<1x8x32xf32>
      %185 = vector.shape_cast %184 : vector<1x8x32xf32> to vector<8x32xf32>
      %c0_58 = arith.constant 0 : index
      %c0_59 = arith.constant 0 : index
      %186 = vector.load %arg12[%c0_58, %c0_59] : memref<8x32xf32, #tpu.memory_space<vmem>>, vector<8x32xf32>
      tpu.vector_store %arg12[%c0_58, %c0_59], %185 {strides = array<i32>} : memref<8x32xf32, #tpu.memory_space<vmem>>, vector<8x32xf32>,
    } else {
    }
    %c0 = arith.constant 0 : index
    %c0_1 = arith.constant 0 : index
    %3 = vector.load %arg12[%c0, %c0_1] : memref<8x32xf32, #tpu.memory_space<vmem>>, vector<8x32xf32>
    %c0_2 = arith.constant 0 : index
    %c0_3 = arith.constant 0 : index
    %c0_4 = arith.constant 0 : index
    %4 = vector.load %arg10[%c0_2, %c0_3, %c0_4] : memref<1x8x64xf32, #tpu.memory_space<vmem>>, vector<1x8x64xf32>
    %5 = vector.shape_cast %4 : vector<1x8x64xf32> to vector<8x64xf32>
    %6 = vector.extract_strided_slice %5 {offsets = [0, 0], sizes = [1, 32], strides = [1, 1]} : vector<8x64xf32> to vector<1x32xf32>
    %7 = vector.extract_strided_slice %5 {offsets = [1, 0], sizes = [1, 32], strides = [1, 1]} : vector<8x64xf32> to vector<1x32xf32>
    %8 = vector.extract_strided_slice %5 {offsets = [2, 0], sizes = [1, 32], strides = [1, 1]} : vector<8x64xf32> to vector<1x32xf32>
    %9 = vector.extract_strided_slice %5 {offsets = [3, 0], sizes = [1, 32], strides = [1, 1]} : vector<8x64xf32> to vector<1x32xf32>
    %10 = vector.extract_strided_slice %5 {offsets = [4, 0], sizes = [1, 32], strides = [1, 1]} : vector<8x64xf32> to vector<1x32xf32>
    %11 = vector.extract_strided_slice %5 {offsets = [5, 0], sizes = [1, 32], strides = [1, 1]} : vector<8x64xf32> to vector<1x32xf32>
    %12 = vector.extract_strided_slice %5 {offsets = [6, 0], sizes = [1, 64], strides = [1, 1]} : vector<8x64xf32> to vector<1x64xf32>
    %13 = vector.extract_strided_slice %5 {offsets = [7, 0], sizes = [1, 32], strides = [1, 1]} : vector<8x64xf32> to vector<1x32xf32>
    %14 = arith.truncf %3 : vector<8x32xf32> to vector<8x32xbf16>
    %c0_5 = arith.constant 0 : index
    %c0_6 = arith.constant 0 : index
    %c0_7 = arith.constant 0 : index
    %15 = vector.load %arg3[%c0_5, %c0_6, %c0_7] : memref<1x32x96xbf16, #tpu.memory_space<vmem>>, vector<1x32x96xbf16>
    %16 = vector.shape_cast %15 : vector<1x32x96xbf16> to vector<32x96xbf16>
    %cst = arith.constant dense<0.000000e+00> : vector<8x96xf32>
    %17 = tpu.matmul %14, %16, %cst {dimension_numbers = #tpu.dot_dimension_numbers<[1], [0], [0], [1], [0, 0, 1, 1], [], []>} : vector<8x32xbf16>, vector<32x96xbf16>, vector<8x96xf32> -> vector<8x96xf32>
    %18 = vector.extract_strided_slice %17 {offsets = [0, 0], sizes = [8, 32], strides = [1, 1]} : vector<8x96xf32> to vector<8x32xf32>
    %19 = vector.extract_strided_slice %17 {offsets = [0, 32], sizes = [8, 32], strides = [1, 1]} : vector<8x96xf32> to vector<8x32xf32>
    %20 = vector.extract_strided_slice %17 {offsets = [0, 64], sizes = [8, 32], strides = [1, 1]} : vector<8x96xf32> to vector<8x32xf32>
    %21 = tpu.iota {dimensions = array<i32: 1>} : vector<1x8x32xi32>
    %22 = vector.shape_cast %21 : vector<1x8x32xi32> to vector<8x32xi32>
    %c0_i32_8 = arith.constant 0 : i32
    %23 = vector.broadcast %c0_i32_8 : i32 to vector<8x32xi32>
    %24 = arith.cmpi eq, %22, %23 : vector<8x32xi32>
    %25 = vector.extract_strided_slice %18 {offsets = [7, 0], sizes = [1, 32], strides = [1, 1]} : vector<8x32xf32> to vector<1x32xf32>
    %26 = vector.extract_strided_slice %18 {offsets = [0, 0], sizes = [7, 32], strides = [1, 1]} : vector<8x32xf32> to vector<7x32xf32>
    %27 = tpu.concatenate %25, %26 in 0 : vector<1x32xf32>, vector<7x32xf32> -> vector<8x32xf32>
    %cst_9 = arith.constant 0.000000e+00 : f32
    %28 = vector.broadcast %cst_9 : f32 to vector<8x32xf32>
    %29 = arith.select %24, %28, %27 : vector<8x32xi1>, vector<8x32xf32>
    %c7_i32 = arith.constant 7 : i32
    %30 = vector.broadcast %c7_i32 : i32 to vector<8x32xi32>
    %31 = arith.cmpi eq, %22, %30 : vector<8x32xi32>
    %32 = vector.extract_strided_slice %20 {offsets = [1, 0], sizes = [7, 32], strides = [1, 1]} : vector<8x32xf32> to vector<7x32xf32>
    %33 = vector.extract_strided_slice %20 {offsets = [0, 0], sizes = [1, 32], strides = [1, 1]} : vector<8x32xf32> to vector<1x32xf32>
    %34 = tpu.concatenate %32, %33 in 0 : vector<7x32xf32>, vector<1x32xf32> -> vector<8x32xf32>
    %cst_10 = arith.constant 0.000000e+00 : f32
    %35 = vector.broadcast %cst_10 : f32 to vector<8x32xf32>
    %36 = arith.select %31, %35, %34 : vector<8x32xi1>, vector<8x32xf32>
    %37 = arith.addf %3, %19 : vector<8x32xf32>
    %38 = arith.addf %37, %29 : vector<8x32xf32>
    %39 = arith.addf %38, %36 : vector<8x32xf32>
    %40 = vector.broadcast %6 : vector<1x32xf32> to vector<8x32xf32>
    %41 = arith.addf %39, %40 : vector<8x32xf32>
    %cst_11 = arith.constant dense<0.000000e+00> : vector<8xf32>
    %42 = vector.multi_reduction <add>, %41, %cst_11 [1] : vector<8x32xf32> to vector<8xf32>
    %43 = vector.shape_cast %42 : vector<8xf32> to vector<8x1xf32>
    %cst_12 = arith.constant 3.200000e+01 : f32
    %44 = vector.broadcast %cst_12 : f32 to vector<8x1xf32>
    %45 = arith.divf %43, %44 : vector<8x1xf32>
    %46 = vector.broadcast %45 : vector<8x1xf32> to vector<8x32xf32>
    %47 = arith.subf %41, %46 : vector<8x32xf32>
    %48 = arith.mulf %47, %47 : vector<8x32xf32>
    %cst_13 = arith.constant dense<0.000000e+00> : vector<8xf32>
    %49 = vector.multi_reduction <add>, %48, %cst_13 [1] : vector<8x32xf32> to vector<8xf32>
    %50 = vector.shape_cast %49 : vector<8xf32> to vector<8x1xf32>
    %cst_14 = arith.constant 3.200000e+01 : f32
    %51 = vector.broadcast %cst_14 : f32 to vector<8x1xf32>
    %52 = arith.divf %50, %51 : vector<8x1xf32>
    %53 = vector.broadcast %45 : vector<8x1xf32> to vector<8x32xf32>
    %54 = arith.subf %41, %53 : vector<8x32xf32>
    %cst_15 = arith.constant 9.99999974E-6 : f32
    %55 = vector.broadcast %cst_15 : f32 to vector<8x1xf32>
    %56 = arith.addf %52, %55 : vector<8x1xf32>
    %57 = math.rsqrt %56 : vector<8x1xf32>
    %58 = vector.broadcast %57 : vector<8x1xf32> to vector<8x32xf32>
    %59 = arith.mulf %54, %58 : vector<8x32xf32>
    %60 = vector.broadcast %7 : vector<1x32xf32> to vector<8x32xf32>
    %61 = arith.mulf %59, %60 : vector<8x32xf32>
    %62 = vector.broadcast %8 : vector<1x32xf32> to vector<8x32xf32>
    %63 = arith.addf %61, %62 : vector<8x32xf32>
    %64 = arith.truncf %63 : vector<8x32xf32> to vector<8x32xbf16>
    %c0_16 = arith.constant 0 : index
    %c0_17 = arith.constant 0 : index
    %c0_18 = arith.constant 0 : index
    %65 = vector.load %arg4[%c0_16, %c0_17, %c0_18] : memref<1x32x96xbf16, #tpu.memory_space<vmem>>, vector<1x32x96xbf16>
    %66 = vector.shape_cast %65 : vector<1x32x96xbf16> to vector<32x96xbf16>
    %cst_19 = arith.constant dense<0.000000e+00> : vector<8x96xf32>
    %67 = tpu.matmul %64, %66, %cst_19 {dimension_numbers = #tpu.dot_dimension_numbers<[1], [0], [0], [1], [0, 0, 1, 1], [], []>} : vector<8x32xbf16>, vector<32x96xbf16>, vector<8x96xf32> -> vector<8x96xf32>
    %68 = vector.extract_strided_slice %67 {offsets = [0, 0], sizes = [8, 8], strides = [1, 1]} : vector<8x96xf32> to vector<8x8xf32>
    %69 = vector.extract_strided_slice %67 {offsets = [0, 8], sizes = [8, 8], strides = [1, 1]} : vector<8x96xf32> to vector<8x8xf32>
    %70 = vector.extract_strided_slice %67 {offsets = [0, 16], sizes = [8, 8], strides = [1, 1]} : vector<8x96xf32> to vector<8x8xf32>
    %71 = vector.extract_strided_slice %67 {offsets = [0, 24], sizes = [8, 8], strides = [1, 1]} : vector<8x96xf32> to vector<8x8xf32>
    %72 = vector.shape_cast %68 : vector<8x8xf32> to vector<1x8x8xf32>
    %73 = vector.shape_cast %69 : vector<8x8xf32> to vector<1x8x8xf32>
    %74 = vector.shape_cast %70 : vector<8x8xf32> to vector<1x8x8xf32>
    %75 = vector.shape_cast %71 : vector<8x8xf32> to vector<1x8x8xf32>
    %76 = tpu.concatenate %72, %73, %74, %75 in 0 : vector<1x8x8xf32>, vector<1x8x8xf32>, vector<1x8x8xf32>, vector<1x8x8xf32> -> vector<4x8x8xf32>
    %77 = vector.extract_strided_slice %67 {offsets = [0, 32], sizes = [8, 8], strides = [1, 1]} : vector<8x96xf32> to vector<8x8xf32>
    %78 = vector.extract_strided_slice %67 {offsets = [0, 40], sizes = [8, 8], strides = [1, 1]} : vector<8x96xf32> to vector<8x8xf32>
    %79 = vector.extract_strided_slice %67 {offsets = [0, 48], sizes = [8, 8], strides = [1, 1]} : vector<8x96xf32> to vector<8x8xf32>
    %80 = vector.extract_strided_slice %67 {offsets = [0, 56], sizes = [8, 8], strides = [1, 1]} : vector<8x96xf32> to vector<8x8xf32>
    %81 = vector.shape_cast %77 : vector<8x8xf32> to vector<1x8x8xf32>
    %82 = vector.shape_cast %78 : vector<8x8xf32> to vector<1x8x8xf32>
    %83 = vector.shape_cast %79 : vector<8x8xf32> to vector<1x8x8xf32>
    %84 = vector.shape_cast %80 : vector<8x8xf32> to vector<1x8x8xf32>
    %85 = tpu.concatenate %81, %82, %83, %84 in 0 : vector<1x8x8xf32>, vector<1x8x8xf32>, vector<1x8x8xf32>, vector<1x8x8xf32> -> vector<4x8x8xf32>
    %86 = vector.extract_strided_slice %67 {offsets = [0, 64], sizes = [8, 8], strides = [1, 1]} : vector<8x96xf32> to vector<8x8xf32>
    %87 = vector.extract_strided_slice %67 {offsets = [0, 72], sizes = [8, 8], strides = [1, 1]} : vector<8x96xf32> to vector<8x8xf32>
    %88 = vector.extract_strided_slice %67 {offsets = [0, 80], sizes = [8, 8], strides = [1, 1]} : vector<8x96xf32> to vector<8x8xf32>
    %89 = vector.extract_strided_slice %67 {offsets = [0, 88], sizes = [8, 8], strides = [1, 1]} : vector<8x96xf32> to vector<8x8xf32>
    %90 = vector.shape_cast %86 : vector<8x8xf32> to vector<1x8x8xf32>
    %91 = vector.shape_cast %87 : vector<8x8xf32> to vector<1x8x8xf32>
    %92 = vector.shape_cast %88 : vector<8x8xf32> to vector<1x8x8xf32>
    %93 = vector.shape_cast %89 : vector<8x8xf32> to vector<1x8x8xf32>
    %94 = tpu.concatenate %90, %91, %92, %93 in 0 : vector<1x8x8xf32>, vector<1x8x8xf32>, vector<1x8x8xf32>, vector<1x8x8xf32> -> vector<4x8x8xf32>
    %95 = arith.truncf %76 : vector<4x8x8xf32> to vector<4x8x8xbf16>
    %96 = arith.truncf %85 : vector<4x8x8xf32> to vector<4x8x8xbf16>
    "tpu.trace_start"() <{level = 10 : i32, message = "bqd,bkd->bqk"}> : () -> ()
    %cst_20 = arith.constant dense<0.000000e+00> : vector<4x8x8xf32>
    %97 = tpu.matmul %95, %96, %cst_20 {dimension_numbers = #tpu.dot_dimension_numbers<[2], [2], [1], [1], [0, 0, 0, 1, 1, 1], [0], [0]>} : vector<4x8x8xbf16>, vector<4x8x8xbf16>, vector<4x8x8xf32> -> vector<4x8x8xf32>
    "tpu.trace_stop"() : () -> ()
    %cst_21 = arith.constant dense<0xFF800000> : vector<4x8xf32>
    %98 = vector.multi_reduction <maximumf>, %97, %cst_21 [2] : vector<4x8x8xf32> to vector<4x8xf32>
    %99 = vector.shape_cast %98 : vector<4x8xf32> to vector<4x8x1xf32>
    %100 = vector.broadcast %99 : vector<4x8x1xf32> to vector<4x8x8xf32>
    %101 = arith.subf %97, %100 : vector<4x8x8xf32>
    %102 = math.exp %101 : vector<4x8x8xf32>
    %cst_22 = arith.constant dense<0.000000e+00> : vector<4x8xf32>
    %103 = vector.multi_reduction <add>, %102, %cst_22 [2] : vector<4x8x8xf32> to vector<4x8xf32>
    %104 = vector.shape_cast %103 : vector<4x8xf32> to vector<4x8x1xf32>
    %105 = tpu.reciprocal %104 {approx = true} : vector<4x8x1xf32> -> vector<4x8x1xf32>
    %106 = vector.broadcast %105 : vector<4x8x1xf32> to vector<4x8x8xf32>
    %107 = arith.mulf %102, %106 : vector<4x8x8xf32>
    %108 = arith.truncf %107 : vector<4x8x8xf32> to vector<4x8x8xbf16>
    %109 = arith.truncf %94 : vector<4x8x8xf32> to vector<4x8x8xbf16>
    "tpu.trace_start"() <{level = 10 : i32, message = "bqk,bkd->bqd"}> : () -> ()
    %cst_23 = arith.constant dense<0.000000e+00> : vector<4x8x8xf32>
    %110 = tpu.matmul %108, %109, %cst_23 {dimension_numbers = #tpu.dot_dimension_numbers<[2], [1], [1], [2], [0, 0, 0, 1, 1, 2], [0], [0]>} : vector<4x8x8xbf16>, vector<4x8x8xbf16>, vector<4x8x8xf32> -> vector<4x8x8xf32>
    "tpu.trace_stop"() : () -> ()
    %111 = vector.extract_strided_slice %110 {offsets = [0, 0, 0], sizes = [1, 8, 8], strides = [1, 1, 1]} : vector<4x8x8xf32> to vector<1x8x8xf32>
    %112 = vector.shape_cast %111 : vector<1x8x8xf32> to vector<8x8xf32>
    %113 = vector.extract_strided_slice %110 {offsets = [1, 0, 0], sizes = [1, 8, 8], strides = [1, 1, 1]} : vector<4x8x8xf32> to vector<1x8x8xf32>
    %114 = vector.shape_cast %113 : vector<1x8x8xf32> to vector<8x8xf32>
    %115 = vector.extract_strided_slice %110 {offsets = [2, 0, 0], sizes = [1, 8, 8], strides = [1, 1, 1]} : vector<4x8x8xf32> to vector<1x8x8xf32>
    %116 = vector.shape_cast %115 : vector<1x8x8xf32> to vector<8x8xf32>
    %117 = vector.extract_strided_slice %110 {offsets = [3, 0, 0], sizes = [1, 8, 8], strides = [1, 1, 1]} : vector<4x8x8xf32> to vector<1x8x8xf32>
    %118 = vector.shape_cast %117 : vector<1x8x8xf32> to vector<8x8xf32>
    %119 = tpu.concatenate %112, %114, %116, %118 in 1 : vector<8x8xf32>, vector<8x8xf32>, vector<8x8xf32>, vector<8x8xf32> -> vector<8x32xf32>
    %120 = arith.truncf %119 : vector<8x32xf32> to vector<8x32xbf16>
    %c0_24 = arith.constant 0 : index
    %c0_25 = arith.constant 0 : index
    %c0_26 = arith.constant 0 : index
    %121 = vector.load %arg5[%c0_24, %c0_25, %c0_26] : memref<1x32x32xbf16, #tpu.memory_space<vmem>>, vector<1x32x32xbf16>
    %122 = vector.shape_cast %121 : vector<1x32x32xbf16> to vector<32x32xbf16>
    %cst_27 = arith.constant dense<0.000000e+00> : vector<8x32xf32>
    %123 = tpu.matmul %120, %122, %cst_27 {dimension_numbers = #tpu.dot_dimension_numbers<[1], [0], [0], [1], [0, 0, 1, 1], [], []>} : vector<8x32xbf16>, vector<32x32xbf16>, vector<8x32xf32> -> vector<8x32xf32>
    %124 = arith.addf %123, %41 : vector<8x32xf32>
    %125 = vector.broadcast %9 : vector<1x32xf32> to vector<8x32xf32>
    %126 = arith.addf %124, %125 : vector<8x32xf32>
    %127 = arith.truncf %41 : vector<8x32xf32> to vector<8x32xbf16>
    %c0_28 = arith.constant 0 : index
    %c0_29 = arith.constant 0 : index
    %c0_30 = arith.constant 0 : index
    %128 = vector.load %arg6[%c0_28, %c0_29, %c0_30] : memref<1x32x32xbf16, #tpu.memory_space<vmem>>, vector<1x32x32xbf16>
    %129 = vector.shape_cast %128 : vector<1x32x32xbf16> to vector<32x32xbf16>
    %cst_31 = arith.constant dense<0.000000e+00> : vector<8x32xf32>
    %130 = tpu.matmul %127, %129, %cst_31 {dimension_numbers = #tpu.dot_dimension_numbers<[1], [0], [0], [1], [0, 0, 1, 1], [], []>} : vector<8x32xbf16>, vector<32x32xbf16>, vector<8x32xf32> -> vector<8x32xf32>
    %131 = arith.addf %126, %130 : vector<8x32xf32>
    %cst_32 = arith.constant dense<0.000000e+00> : vector<8xf32>
    %132 = vector.multi_reduction <add>, %131, %cst_32 [1] : vector<8x32xf32> to vector<8xf32>
    %133 = vector.shape_cast %132 : vector<8xf32> to vector<8x1xf32>
    %cst_33 = arith.constant 3.200000e+01 : f32
    %134 = vector.broadcast %cst_33 : f32 to vector<8x1xf32>
    %135 = arith.divf %133, %134 : vector<8x1xf32>
    %136 = vector.broadcast %135 : vector<8x1xf32> to vector<8x32xf32>
    %137 = arith.subf %131, %136 : vector<8x32xf32>
    %138 = arith.mulf %137, %137 : vector<8x32xf32>
    %cst_34 = arith.constant dense<0.000000e+00> : vector<8xf32>
    %139 = vector.multi_reduction <add>, %138, %cst_34 [1] : vector<8x32xf32> to vector<8xf32>
    %140 = vector.shape_cast %139 : vector<8xf32> to vector<8x1xf32>
    %cst_35 = arith.constant 3.200000e+01 : f32
    %141 = vector.broadcast %cst_35 : f32 to vector<8x1xf32>
    %142 = arith.divf %140, %141 : vector<8x1xf32>
    %143 = vector.broadcast %135 : vector<8x1xf32> to vector<8x32xf32>
    %144 = arith.subf %131, %143 : vector<8x32xf32>
    %cst_36 = arith.constant 9.99999974E-6 : f32
    %145 = vector.broadcast %cst_36 : f32 to vector<8x1xf32>
    %146 = arith.addf %142, %145 : vector<8x1xf32>
    %147 = math.rsqrt %146 : vector<8x1xf32>
    %148 = vector.broadcast %147 : vector<8x1xf32> to vector<8x32xf32>
    %149 = arith.mulf %144, %148 : vector<8x32xf32>
    %150 = vector.broadcast %10 : vector<1x32xf32> to vector<8x32xf32>
    %151 = arith.mulf %149, %150 : vector<8x32xf32>
    %152 = vector.broadcast %11 : vector<1x32xf32> to vector<8x32xf32>
    %153 = arith.addf %151, %152 : vector<8x32xf32>
    %154 = arith.truncf %153 : vector<8x32xf32> to vector<8x32xbf16>
    %c0_37 = arith.constant 0 : index
    %c0_38 = arith.constant 0 : index
    %c0_39 = arith.constant 0 : index
    %155 = vector.load %arg7[%c0_37, %c0_38, %c0_39] : memref<1x32x64xbf16, #tpu.memory_space<vmem>>, vector<1x32x64xbf16>
    %156 = vector.shape_cast %155 : vector<1x32x64xbf16> to vector<32x64xbf16>
    %cst_40 = arith.constant dense<0.000000e+00> : vector<8x64xf32>
    %157 = tpu.matmul %154, %156, %cst_40 {dimension_numbers = #tpu.dot_dimension_numbers<[1], [0], [0], [1], [0, 0, 1, 1], [], []>} : vector<8x32xbf16>, vector<32x64xbf16>, vector<8x64xf32> -> vector<8x64xf32>
    %158 = vector.broadcast %12 : vector<1x64xf32> to vector<8x64xf32>
    %159 = arith.addf %157, %158 : vector<8x64xf32>
    %cst_41 = arith.constant 5.000000e-01 : f32
    %160 = vector.broadcast %cst_41 : f32 to vector<8x64xf32>
    %161 = arith.mulf %160, %159 : vector<8x64xf32>
    %cst_42 = arith.constant 0.707106769 : f32
    %162 = vector.broadcast %cst_42 : f32 to vector<8x64xf32>
    %163 = arith.mulf %159, %162 : vector<8x64xf32>
    %164 = math.erf %163 : vector<8x64xf32>
    %cst_43 = arith.constant 1.000000e+00 : f32
    %165 = vector.broadcast %cst_43 : f32 to vector<8x64xf32>
    %166 = arith.addf %165, %164 : vector<8x64xf32>
    %167 = arith.mulf %161, %166 : vector<8x64xf32>
    %168 = arith.truncf %167 : vector<8x64xf32> to vector<8x64xbf16>
    %c0_44 = arith.constant 0 : index
    %c0_45 = arith.constant 0 : index
    %c0_46 = arith.constant 0 : index
    %169 = vector.load %arg8[%c0_44, %c0_45, %c0_46] : memref<1x64x32xbf16, #tpu.memory_space<vmem>>, vector<1x64x32xbf16>
    %170 = vector.shape_cast %169 : vector<1x64x32xbf16> to vector<64x32xbf16>
    %cst_47 = arith.constant dense<0.000000e+00> : vector<8x32xf32>
    %171 = tpu.matmul %168, %170, %cst_47 {dimension_numbers = #tpu.dot_dimension_numbers<[1], [0], [0], [1], [0, 0, 1, 1], [], []>} : vector<8x64xbf16>, vector<64x32xbf16>, vector<8x32xf32> -> vector<8x32xf32>
    %172 = arith.addf %171, %131 : vector<8x32xf32>
    %173 = vector.broadcast %13 : vector<1x32xf32> to vector<8x32xf32>
    %174 = arith.addf %172, %173 : vector<8x32xf32>
    %175 = arith.truncf %131 : vector<8x32xf32> to vector<8x32xbf16>
    %c0_48 = arith.constant 0 : index
    %c0_49 = arith.constant 0 : index
    %c0_50 = arith.constant 0 : index
    %176 = vector.load %arg9[%c0_48, %c0_49, %c0_50] : memref<1x32x32xbf16, #tpu.memory_space<vmem>>, vector<1x32x32xbf16>
    %177 = vector.shape_cast %176 : vector<1x32x32xbf16> to vector<32x32xbf16>
    %cst_51 = arith.constant dense<0.000000e+00> : vector<8x32xf32>
    %178 = tpu.matmul %175, %177, %cst_51 {dimension_numbers = #tpu.dot_dimension_numbers<[1], [0], [0], [1], [0, 0, 1, 1], [], []>} : vector<8x32xbf16>, vector<32x32xbf16>, vector<8x32xf32> -> vector<8x32xf32>
    %179 = arith.addf %174, %178 : vector<8x32xf32>
    %c0_52 = arith.constant 0 : index
    %c0_53 = arith.constant 0 : index
    %180 = vector.load %arg12[%c0_52, %c0_53] : memref<8x32xf32, #tpu.memory_space<vmem>>, vector<8x32xf32>
    tpu.vector_store %arg12[%c0_52, %c0_53], %179 {strides = array<i32>} : memref<8x32xf32, #tpu.memory_space<vmem>>, vector<8x32xf32>,
    %c1_i32 = arith.constant 1 : i32
    %181 = arith.cmpi eq, %arg1, %c1_i32 : i32
    %182 = arith.extui %181 : i1 to i32
    %c0_i32_54 = arith.constant 0 : i32
    %183 = arith.cmpi ne, %182, %c0_i32_54 : i32
    scf.if %183 {
      %184 = vector.shape_cast %179 : vector<8x32xf32> to vector<1x8x32xf32>
      %c0_55 = arith.constant 0 : index
      %c0_56 = arith.constant 0 : index
      %c0_57 = arith.constant 0 : index
      %185 = vector.load %arg11[%c0_55, %c0_56, %c0_57] : memref<1x8x32xf32, #tpu.memory_space<vmem>>, vector<1x8x32xf32>
      tpu.vector_store %arg11[%c0_55, %c0_56, %c0_57], %184 {strides = array<i32>} : memref<1x8x32xf32, #tpu.memory_space<vmem>>, vector<1x8x32xf32>,
    } else {
    }
    return
  }
  func.func @transform_0(%arg0: i32, %arg1: i32) -> (i32, i32, i32) {
    %c0_i32 = arith.constant 0 : i32
    %c0_i32_0 = arith.constant 0 : i32
    %c0_i32_1 = arith.constant 0 : i32
    return %arg0, %c0_i32, %c0_i32_0 : i32, i32, i32
  }
  func.func @transform_1(%arg0: i32, %arg1: i32) -> (i32, i32, i32) {
    %c0_i32 = arith.constant 0 : i32
    %c0_i32_0 = arith.constant 0 : i32
    %c0_i32_1 = arith.constant 0 : i32
    return %arg1, %c0_i32, %c0_i32_0 : i32, i32, i32
  }
  func.func @transform_2(%arg0: i32, %arg1: i32) -> (i32, i32, i32) {
    %c0_i32 = arith.constant 0 : i32
    %c0_i32_0 = arith.constant 0 : i32
    %c0_i32_1 = arith.constant 0 : i32
    return %arg1, %c0_i32, %c0_i32_0 : i32, i32, i32
  }
  func.func @transform_3(%arg0: i32, %arg1: i32) -> (i32, i32, i32) {
    %c0_i32 = arith.constant 0 : i32
    %c0_i32_0 = arith.constant 0 : i32
    %c0_i32_1 = arith.constant 0 : i32
    return %arg1, %c0_i32, %c0_i32_0 : i32, i32, i32
  }
  func.func @transform_4(%arg0: i32, %arg1: i32) -> (i32, i32, i32) {
    %c0_i32 = arith.constant 0 : i32
    %c0_i32_0 = arith.constant 0 : i32
    %c0_i32_1 = arith.constant 0 : i32
    return %arg1, %c0_i32, %c0_i32_0 : i32, i32, i32
  }
  func.func @transform_5(%arg0: i32, %arg1: i32) -> (i32, i32, i32) {
    %c0_i32 = arith.constant 0 : i32
    %c0_i32_0 = arith.constant 0 : i32
    %c0_i32_1 = arith.constant 0 : i32
    return %arg1, %c0_i32, %c0_i32_0 : i32, i32, i32
  }
  func.func @transform_6(%arg0: i32, %arg1: i32) -> (i32, i32, i32) {
    %c0_i32 = arith.constant 0 : i32
    %c0_i32_0 = arith.constant 0 : i32
    %c0_i32_1 = arith.constant 0 : i32
    return %arg1, %c0_i32, %c0_i32_0 : i32, i32, i32
  }
  func.func @transform_7(%arg0: i32, %arg1: i32) -> (i32, i32, i32) {
    %c0_i32 = arith.constant 0 : i32
    %c0_i32_0 = arith.constant 0 : i32
    %c0_i32_1 = arith.constant 0 : i32
    return %arg1, %c0_i32, %c0_i32_0 : i32, i32, i32
  }
  func.func @transform_8(%arg0: i32, %arg1: i32) -> (i32, i32, i32) {
    %c0_i32 = arith.constant 0 : i32
    %c0_i32_0 = arith.constant 0 : i32
    %c0_i32_1 = arith.constant 0 : i32
    return %arg1, %c0_i32, %c0_i32_0 : i32, i32, i32
  }
  func.func @transform_9(%arg0: i32, %arg1: i32) -> (i32, i32, i32) {
    %c0_i32 = arith.constant 0 : i32
    %c0_i32_0 = arith.constant 0 : i32
    %c0_i32_1 = arith.constant 0 : i32
    return %arg0, %c0_i32, %c0_i32_0 : i32, i32, i32
  }
}

</mosaic_0001>

<bundles_post_ra>
// kernel: tpu_custom_call.1
= control target key start
LH: loop header
LB: loop body
LE: loop exit
PB: predicated region body
PF: predicated region fallthrough
CT: control target
= control target key end

     0   :  { %s3142_s0 = inlined_call_operand.hbm [shape: f32[2,8,32], index: 0, kind: input, shape index: {}]   ;;  %s3143_s1 = inlined_call_operand.vmem [shape: bf16[2,32,96], index: 1, kind: input, shape index: {}]   ;;  %s3144_s2 = inlined_call_operand.vmem [shape: bf16[2,32,96], index: 2, kind: input, shape index: {}]   ;;  %s3145_s3 = inlined_call_operand.vmem [shape: bf16[2,32,32], index: 3, kind: input, shape index: {}]   ;;  %s3146_s4 = inlined_call_operand.hbm [shape: bf16[2,32,32], index: 4, kind: input, shape index: {}]   ;;  %s3147_s5 = inlined_call_operand.hbm [shape: bf16[2,32,64], index: 5, kind: input, shape index: {}]   ;;  %s3148_s6 = inlined_call_operand.vmem [shape: bf16[2,64,32], index: 6, kind: input, shape index: {}]   ;;  %s3149_s7 = inlined_call_operand.hbm [shape: bf16[2,32,32], index: 7, kind: input, shape index: {}]   ;;  %s3150_s8 = inlined_call_operand.vmem [shape: f32[2,8,64], index: 8, kind: input, shape index: {}]   ;;  %s3151_s9 = inlined_call_operand.hbm [shape: f32[2,8,32], index: 9, kind: output, shape index: {}]  }
   0x1   :  { %3176 = sst [smem:[#allocation28_spill]] %s3142_s0 }
   0x2   :  { %3177 = sst [smem:[#allocation29_spill]] %s3143_s1 }
   0x3   :  { %3178 = sst [smem:[#allocation30_spill]] %s3144_s2 }
   0x4   :  { %3179 = sst [smem:[#allocation31_spill]] %s3145_s3 }
   0x5   :  { %3180 = sst [smem:[#allocation32_spill]] %s3146_s4 }
   0x6   :  { %3181 = sst [smem:[#allocation33_spill]] %s3147_s5 }
   0x7   :  { %3182 = sst [smem:[#allocation34_spill]] %s3148_s6 }
   0x8   :  { %3183 = sst [smem:[#allocation35_spill]] %s3149_s7 }
   0x9   :  { %3184 = sst [smem:[#allocation36_spill]] %s3150_s8 }
   0xa   :  { %3185 = sst [smem:[#allocation37_spill]] %s3151_s9 }
   0xb   :  { %14 = vsyncpa [#allocation4], 0 }
   0xc   :  { %16 = vsyncpa [#allocation4 + $0x1], 0 }
   0xd   :  { %17 = vsyncpa [#allocation7], 0 }
   0xe   :  { %19 = vsyncpa [#allocation7 + $0x1], 0 }
   0xf   :  { %20 = vsyncpa [#allocation10], 0 }
  0x10   :  { %22 = vsyncpa [#allocation10 + $0x1], 0 }
  0x11   :  { %23 = vsyncpa [#allocation5], 0 }
  0x12   :  { %25 = vsyncpa [#allocation5 + $0x1], 0  ;;  %s2535_s30 = smov 0   ;;  %s2537_s10 = smov 0  }
  0x13   :  { %s2539_s11 = smov 0   ;;  %s2541_s12 = smov 0  }
  0x14   :  { %s2543_s13 = smov 0   ;;  %s2545_s14 = smov 0  }
  0x15   :  { %s2547_s15 = smov 0   ;;  %s2549_s16 = smov 0  }
  0x16   :  { %s2551_s17 = smov 0   ;;  %s2553_s18 = smov 0  }
  0x17   :  { %s2555_s19 = smov 0  }
  0x18 LB: > { %3186 = sst [smem:[#allocation16_spill]] %s2442_s13  ;;  %s40_s20 = sadd.s32 1, %s2458_s17  ;;  %s2466_s19 = sphi %s2555_s19, %s31_s19   ;;  %s2462_s18 = sphi %s2553_s18, %s3249_s18   ;;  %s2458_s17 = sphi %s2551_s17, %s3248_s17   ;;  %s2454_s16 = sphi %s2549_s16, %s3247_s16   ;;  %s2450_s15 = sphi %s2547_s15, %s3246_s15   ;;  %s2446_s14 = sphi %s2545_s14, %s3245_s14   ;;  %s2442_s13 = sphi %s2543_s13, %s3244_s13   ;;  %s2438_s12 = sphi %s2541_s12, %s3243_s12   ;;  %s2434_s11 = sphi %s2539_s11, %s3252_s11   ;;  %s2430_s10 = sphi %s2537_s10, %s3251_s10   ;;  %s2426_s30 = sphi %s2535_s30, %s3250_s30  }
  0x19   : > { %3187 = sst [smem:[#allocation17_spill]] %s2446_s14  ;;  %p3157_p0 = scmp.eq.s32.totalorder %s2466_s19, 0 }
  0x1a   : > { %3188 = sst [smem:[#allocation18_spill]] %s2450_s15  ;;  %p2592_p1 = scmp.ge.s32.totalorder %s40_s20, 2 }
  0x1b   : > { %3189 = sst [smem:[#allocation19_spill]] %s2454_s16  ;;  %s154_s22 = sadd.s32 1, %s2434_s11 }
  0x1c   : > { %3190 = sst [smem:[#allocation20_spill]] %s2458_s17  ;;  %p161_p2 = scmp.ne.s32.totalorder %s2434_s11, %s2430_s10 }
  0x1d   : > { %3191 = sst [smem:[#allocation21_spill]] %s2462_s18  ;;  %s3254_s20 = smov (%p2592_p1, %s40_s20), 0 }
  0x1e   : > { %s3192_s21 = scalar_select %p2592_p1, 1, 0 }
  0x1f   : > { %3193 = sst [smem:[#allocation22_spill]] %s3254_s20  ;;  %p163_p3 = por %p161_p2, %p3157_p0 }
  0x20   : > { %p3156_p4 = scmp.lt.s32.totalorder %s2466_s19, 4  ;;  %s151_s23 = ssub.s32 %s2458_s17, %s3254_s20 }
  0x21   : > { %s363_s24 = sand.u32 1, %s2466_s19   ;;  %p152_p5 = scmp.eq.s32.totalorder %s151_s23, 0 }
  0x22   : > { %s3154_s25 = sand.u32 1, %s2434_s11   ;;  %s2611_s26 = sshll.u32 %s2458_s17, 8 }
  0x23   : > { %s2614_s27 = scalar_select %p152_p5, %s2434_s11, %s154_s22  }
  0x24   : > { %s2618_s28 = sshll.u32 %s3154_s25, 4  ;;  %s3195_s4 = sld [smem:[#allocation32_spill]] }
  0x25   : > { %3194 = sst [smem:[#allocation23_spill]] %s2614_s27  ;;  %p2628_p6 = pnand %p3156_p4, %p163_p3 }
  0x26   : > { %s367_s22 = scalar_lea.vmem [#allocation6], %s2618_s28  ;;  %s2636_s25 = scalar_lea.sflag [#allocation7], %s363_s24 }
  0x27   : > { %s3196_s23 = scalar_select %p2628_p6, 1, 0 }
  0x28   : > { %s374_s20 = sshll.u32 %s367_s22, 4  ;;  %p2642_p9 = pneg %p2628_p6  ;;  %s2633_s20 = int_to_ptr.vmem [resolvable:$true] %s374_s20 }
  0x2a   : > { %s2624_s16 = scalar_lea.hbm %s3195_s4, %s2611_s26  ;;  %s2221_s22 = scalar_lea.hbm %s3195_s4, 512 }
  0x2b   : > { %s2216_s9 = scalar_lea.hbm %s2624_s16, 256  ;;  %p2222_p12 = scmp.lt.u32.totalorder %s2624_s16, %s3195_s4 }
  0x2c   : > { %p2217_p8 = scmp.ne.s32.totalorder %s2624_s16, %s2216_s9  ;;  %p2223_p13 = scmp.lt.u32.totalorder %s2221_s22, %s2216_s9 }
  0x2d   : > { %p2225_p3 = scmp.lt.u32.totalorder %s2216_s9, %s2624_s16 }
  0x2e   : > { %p2219_p10 = pnand %p2642_p9, %p2217_p8  ;;  %p2224_p2 = por %p2223_p13, %p2222_p12 }
  0x30   : > { %p2220_p11 = pneg %p2219_p10  ;;  %p2226_p5 = por %p2225_p3, %p2224_p2 }
  0x32   : > { %p2227_p4 = pnand %p2226_p5, %p2220_p11 }
  0x34   : > { %2230 = shalt.err (!%p2227_p4)
}
  0x35   : > { %s2231_s24 = scalar_lea.vmem %s2633_s20, 256  ;;  %s2468_s17 = smov [#allocation6]  }
  0x36   : > { %p2232_p8 = scmp.ne.s32.totalorder %s2633_s20, %s2231_s24  ;;  %s2236_s27 = sshll.u32 %s2468_s17, 4  ;;  %s2237_s27 = int_to_ptr.vmem [resolvable:$false] %s2236_s27 }
  0x37   : > { %s2238_s6 = scalar_lea.vmem %s2237_s27, 512  ;;  %p2239_p7 = scmp.lt.s32.totalorder %s2633_s20, %s2237_s27 }
  0x38   : > { %p2234_p10 = pnand %p2232_p8, %p2642_p9  ;;  %p2240_p1 = scmp.lt.s32.totalorder %s2238_s6, %s2231_s24 }
  0x3a   : > { %p2235_p0 = pneg %p2234_p10  ;;  %p2241_p12 = por %p2240_p1, %p2239_p7 }
  0x3c   : > { %p2242_p13 = pnand %p2241_p12, %p2235_p0 }
  0x3e   : > { %2245 = shalt.err (!%p2242_p13)
}
  0x3f   : > { %s3159_s8 = smov 64   ;;  %s3161_s9 = smov 4  }
  0x40   : > { %2065 = dma.hbm_to_vmem [thread:$0]  (!%p2628_p6), %s2624_s16, 256, %s2633_s20, %s2636_s25, %s3159_s8, %s3159_s8, %s3161_s9  }
  0x41   : > { %p439_p0 = scmp.lt.s32.totalorder %s2466_s19, 5  ;;  %p3198_p1 = scmp.ge.s32.totalorder %s2466_s19, 1 }
  0x42   : > { %s2677_s24 = sadd.s32 4294967295, %s2466_s19   ;;  %s1817_s17 = sadd.s32 4294967294, %s2466_s19  }
  0x43   : > { %p2672_p4 = pnand %p3198_p1, %p439_p0  ;;  %s43_s27 = sadd.s32 1, %s2462_s18 }
  0x44   : > { %s50_s6 = sadd.s32 1, %s2446_s14  ;;  %p3200_p7 = scmp.ne.s32.totalorder %s3192_s21, 0 }
  0x45   : > { %s3199_s22 = scalar_select %p2672_p4, 1, 0 }
  0x46   : > { %s3256_s27 = smov (!%p3200_p7, %s43_s27), %s2462_s18  ;;  %p57_p11 = scmp.ne.s32.totalorder %s2446_s14, %s2442_s13 }
  0x47   : > { %p63_p2 = scmp.ne.s32.totalorder %s2442_s13, %s2438_s12  ;;  %p45_p3 = scmp.ge.s32.totalorder %s3256_s27, 2 }
  0x48   : > { %p64_p5 = scmp.eq.s32.totalorder %s2677_s24, 0  ;;  %p3201_p8 = scmp.eq.s32.totalorder %s2466_s19, 0 }
  0x49   : > { %p167_p12 = scmp.ne.s32.totalorder %s2430_s10, %s2426_s30  ;;  %s3258_s27 = smov (%p45_p3, %s3256_s27), 0 }
  0x4a   : > { %p2695_p10 = por %p3201_p8, %p57_p11  ;;  %3203 = sst [smem:[#allocation24_spill]] %s3258_s27 }
  0x4b   : > { %p2706_p13 = por %p64_p5, %p63_p2  ;;  %p2710_p0 = por %p167_p12, %p64_p5 }
  0x4c   : > { %s47_s8 = ssub.s32 %s2462_s18, %s3258_s27  ;;  %p295_p1 = scmp.eq.s32.totalorder %s2677_s24, 3 }
  0x4d   : > { %s3204_s20 = scalar_select %p2706_p13, 1, 0 }
  0x4e   : > { %s3205_s21 = scalar_select %p2710_p0, 1, 0 }
  0x4f   : > { %p48_p7 = scmp.eq.s32.totalorder %s47_s8, 0  ;;  %p301_p8 = scmp.eq.s32.totalorder %s1817_s17, 3 }
  0x50   : > { %p2720_p3 = por %p295_p1, %p57_p11  ;;  %s321_s9 = sand.u32 1, %s2446_s14  }
  0x51   : > { %s2726_s4 = scalar_select %p48_p7, %s2446_s14, %s50_s6  }
  0x52   : > { %s3206_s30 = scalar_select %p2720_p3, 1, 0 }
  0x53   : > { %3208 = sst [smem:[#allocation26_spill]] %s2726_s4  ;;  %p2731_p4 = por %p301_p8, %p63_p2 }
  0x54   : > { %3207 = sst [smem:[#allocation25_spill]] %s3206_s30  ;;  %s1820_s2 = sshll.u32 %s321_s9, 3 }
  0x55   : > { %s3209_s3 = scalar_select %p2731_p4, 1, 0 }
  0x56   : > { %s1821_s1 = sshll.u32 %s2462_s18, 7  ;;  %s3211_s0 = sld [smem:[#allocation28_spill]] }
  0x57   : > { %3210 = sst [smem:[#allocation27_spill]] %s3209_s3  ;;  %s325_s17 = scalar_lea.vmem [#allocation3], %s1820_s2 }
  0x58   : > { %s332_s30 = sshll.u32 %s325_s17, 4  ;;  %p3212_p11 = scmp.lt.s32.totalorder %s2466_s19, 4  ;;  %s2749_s30 = int_to_ptr.vmem [resolvable:$true] %s332_s30 }
  0x59   : > { %s3214_s5 = sld [smem:[#allocation33_spill]]  ;;  %s322_s27 = scalar_lea.sflag [#allocation4], %s321_s9 }
  0x5a   : > { %p2745_p5 = pnand %p3212_p11, %p2695_p10 }
  0x5c   : > { %s2739_s8 = scalar_lea.hbm %s3211_s0, %s1821_s1  ;;  %p2248_p12 = pneg %p2745_p5 }
  0x5d   : > { %s2246_s4 = scalar_lea.hbm %s2739_s8, 128  ;;  %s2251_s17 = scalar_lea.hbm %s3211_s0, 256 }
  0x5e   : > { %p2247_p2 = scmp.ne.s32.totalorder %s2739_s8, %s2246_s4  ;;  %p2252_p7 = scmp.lt.u32.totalorder %s2739_s8, %s3211_s0 }
  0x5f   : > { %s2755_s1 = scalar_lea.hbm %s3214_s5, %s2611_s26  ;;  %p2253_p8 = scmp.lt.u32.totalorder %s2251_s17, %s2246_s4 }
  0x60   : > { %p2249_p10 = pnand %p2248_p12, %p2247_p2  ;;  %p2255_p4 = scmp.lt.u32.totalorder %s2246_s4, %s2739_s8 }
  0x61   : > { %p2254_p11 = por %p2253_p8, %p2252_p7 }
  0x62   : > { %p2250_p1 = pneg %p2249_p10 }
  0x63   : > { %p2256_p3 = por %p2255_p4, %p2254_p11 }
  0x65   : > { %p2257_p0 = pnand %p2256_p3, %p2250_p1 }
  0x67   : > { %2260 = shalt.err (!%p2257_p0)
}
  0x68   : > { %s2261_s18 = scalar_lea.vmem %s2749_s30, 128  ;;  %s2471_s9 = smov [#allocation3]  }
  0x69   : > { %p2262_p2 = scmp.ne.s32.totalorder %s2749_s30, %s2261_s18  ;;  %s2266_s15 = sshll.u32 %s2471_s9, 4  ;;  %s2267_s15 = int_to_ptr.vmem [resolvable:$false] %s2266_s15 }
  0x6a   : > { %s2268_s3 = scalar_lea.vmem %s2267_s15, 256  ;;  %p2269_p6 = scmp.lt.s32.totalorder %s2749_s30, %s2267_s15 }
  0x6b   : > { %p2264_p10 = pnand %p2262_p2, %p2248_p12  ;;  %p2270_p7 = scmp.lt.s32.totalorder %s2268_s3, %s2261_s18 }
  0x6d   : > { %p2265_p13 = pneg %p2264_p10  ;;  %p2271_p8 = por %p2270_p7, %p2269_p6 }
  0x6f   : > { %p2272_p4 = pnand %p2271_p8, %p2265_p13 }
  0x71   : > { %2275 = shalt.err (!%p2272_p4)
}
  0x72   : > { %2062 = dma.hbm_to_vmem [thread:$0]  (!%p2745_p5), %s2739_s8, 128, %s2749_s30, %s322_s27  }
  0x73   : > { %s388_s4 = scalar_lea.vmem [#allocation8], %s2618_s28  ;;  %s2276_s2 = scalar_lea.hbm %s2755_s1, 256 }
  0x74   : > { %s395_s14 = sshll.u32 %s388_s4, 4  ;;  %p2277_p0 = scmp.ne.s32.totalorder %s2755_s1, %s2276_s2  ;;  %s2783_s14 = int_to_ptr.vmem [resolvable:$true] %s395_s14 }
  0x75   : > { %s2281_s17 = scalar_lea.hbm %s3214_s5, 512  ;;  %p2282_p3 = scmp.lt.u32.totalorder %s2755_s1, %s3214_s5 }
  0x76   : > { %p2279_p6 = pnand %p2277_p0, %p2642_p9  ;;  %p2283_p12 = scmp.lt.u32.totalorder %s2281_s17, %s2276_s2 }
  0x77   : > { %p2285_p5 = scmp.lt.u32.totalorder %s2276_s2, %s2755_s1 }
  0x78   : > { %p2280_p13 = pneg %p2279_p6  ;;  %p2284_p1 = por %p2283_p12, %p2282_p3 }
  0x7a   : > { %p2286_p11 = por %p2285_p5, %p2284_p1 }
  0x7c   : > { %p2287_p2 = pnand %p2286_p11, %p2280_p13 }
  0x7e   : > { %2290 = shalt.err (!%p2287_p2)
}
  0x7f   : > { %s2291_s30 = scalar_lea.vmem %s2783_s14, 256  ;;  %s2472_s8 = smov [#allocation8]  }
  0x80   : > { %p2292_p10 = scmp.ne.s32.totalorder %s2783_s14, %s2291_s30  ;;  %s2296_s27 = sshll.u32 %s2472_s8, 4  ;;  %s2297_s27 = int_to_ptr.vmem [resolvable:$false] %s2296_s27 }
  0x81   : > { %s2298_s15 = scalar_lea.vmem %s2297_s27, 512  ;;  %p2299_p4 = scmp.lt.s32.totalorder %s2783_s14, %s2297_s27 }
  0x82   : > { %p2294_p7 = pnand %p2292_p10, %p2642_p9  ;;  %p2300_p0 = scmp.lt.s32.totalorder %s2298_s15, %s2291_s30 }
  0x84   : > { %p2295_p8 = pneg %p2294_p7  ;;  %p2301_p6 = por %p2300_p0, %p2299_p4 }
  0x86   : > { %p2302_p3 = pnand %p2301_p6, %p2295_p8 }
  0x88   : > { %2305 = shalt.err (!%p2302_p3)
}
  0x89   : > { %p3215_p13 = scmp.ne.s32.totalorder %s3196_s23, 0  ;;  %s3216_s3 = smov 4  }
  0x8a   : > { %s3217_s4 = smov 64   ;;  %s3218_s7 = sld [smem:[#allocation35_spill]] }
  0x8b   : > { %2068 = dma.hbm_to_vmem [thread:$0]  (!%p3215_p13), %s2755_s1, 256, %s2783_s14, %s2636_s25, %s3217_s4, %s3217_s4, %s3216_s3  }
  0x8c   : > { %s417_s17 = scalar_lea.vmem [#allocation9], %s2618_s28  ;;  %s3219_s9 = sand.u32 1, %s2434_s11  }
  0x8d   : > { %s424_s18 = sshll.u32 %s417_s17, 4  ;;  %s2821_s30 = scalar_lea.sflag [#allocation10], %s3219_s9  ;;  %s2817_s18 = int_to_ptr.vmem [resolvable:$true] %s424_s18 }
  0x90   : > { %s2814_s6 = scalar_lea.hbm %s3218_s7, %s2611_s26  ;;  %s2311_s26 = scalar_lea.hbm %s3218_s7, 512 }
  0x91   : > { %s2306_s8 = scalar_lea.hbm %s2814_s6, 256  ;;  %p2312_p11 = scmp.lt.u32.totalorder %s2814_s6, %s3218_s7 }
  0x92   : > { %p2307_p12 = scmp.ne.s32.totalorder %s2814_s6, %s2306_s8  ;;  %p2313_p2 = scmp.lt.u32.totalorder %s2311_s26, %s2306_s8 }
  0x93   : > { %p2315_p7 = scmp.lt.u32.totalorder %s2306_s8, %s2814_s6 }
  0x94   : > { %p2309_p1 = pnand %p2307_p12, %p2642_p9  ;;  %p2314_p10 = por %p2313_p2, %p2312_p11 }
  0x96   : > { %p2310_p5 = pneg %p2309_p1  ;;  %p2316_p8 = por %p2315_p7, %p2314_p10 }
  0x98   : > { %p2317_p4 = pnand %p2316_p8, %p2310_p5 }
  0x9a   : > { %2320 = shalt.err (!%p2317_p4)
}
  0x9b   : > { %s2321_s28 = scalar_lea.vmem %s2817_s18, 256  ;;  %s2473_s15 = smov [#allocation9]  }
  0x9c   : > { %p2322_p0 = scmp.ne.s32.totalorder %s2817_s18, %s2321_s28  ;;  %s2326_s2 = sshll.u32 %s2473_s15, 4  ;;  %s2327_s2 = int_to_ptr.vmem [resolvable:$false] %s2326_s2 }
  0x9d   : > { %s2328_s16 = scalar_lea.vmem %s2327_s2, 512  ;;  %p2329_p12 = scmp.lt.s32.totalorder %s2817_s18, %s2327_s2 }
  0x9e   : > { %p2324_p6 = pnand %p2322_p0, %p2642_p9  ;;  %p2330_p1 = scmp.lt.s32.totalorder %s2328_s16, %s2321_s28 }
  0xa0   : > { %p2325_p3 = pneg %p2324_p6  ;;  %p2331_p11 = por %p2330_p1, %p2329_p12 }
  0xa2   : > { %p2332_p2 = pnand %p2331_p11, %p2325_p3 }
  0xa4   : > { %2335 = shalt.err (!%p2332_p2)
}
  0xa5   : > { %2071 = dma.hbm_to_vmem [thread:$0]  (!%p3215_p13), %s2814_s6, 256, %s2817_s18, %s2821_s30, %s3217_s4, %s3217_s4, %s3216_s3  }
  0xa6   : > { %p3220_p9 = scmp.ne.s32.totalorder %s3199_s22, 0 }
  0xa7   : > { %s2851_s29 = sand.u32 (!%p3220_p9), 1, %s2442_s13   ;;  %p3221_p5 = scmp.ne.s32.totalorder (!%p3220_p9), %s3204_s20, 0 }
  0xa8   : > { %443 = sbr.rel (%p3220_p9) target bundleno = 3205 (0xc85), region = 56  ;;  %s1832_s17 = sshll.u32 (!%p3220_p9), %s2851_s29, 3 }
  0xa9   : > { %s446_s9 = scalar_lea.sflag (!%p3220_p9), [#allocation4], %s2851_s29  ;;  %s449_s8 = scalar_lea.vmem (!%p3220_p9), [#allocation3], %s1832_s17 }
  0xaf   : > { %2409 = dma.done.wait (%p3221_p5), %s446_s9, 128  }
  0xb0   : > { %2411 = vsyncadd (%p3221_p5), %s446_s9, 4294967168  ;;  %s454_s23 = sand.u32 1, %s2677_s24   ;;  %s456_s22 = sand.u32 1, %s2430_s10  }
  0xb1   : > { %s2861_s3 = sshll.u32 %s456_s22, 4  ;;  %s455_s4 = scalar_lea.sflag [#allocation7], %s454_s23 }
  0xb2   : > { %p3222_p13 = scmp.ne.s32.totalorder %s3205_s21, 0 }
  0xb4   : > { %2413 = dma.done.wait (%p3222_p13), %s455_s4, 512  }
  0xb5   : > { %2415 = vsyncadd (%p3222_p13), %s455_s4, 4294966784  ;;  %s473_s18 = scalar_lea.sflag [#allocation10], %s456_s22 }
  0xb6   : > { %2417 = dma.done.wait (%p3222_p13), %s473_s18, 256  }
  0xb7   : > { %2419 = vsyncadd (%p3222_p13), %s473_s18, 4294967040  ;;  %s3223_s24 = sld [smem:[#allocation18_spill]]  ;;  %s3224_s28 = sld [smem:[#allocation29_spill]] }
  0xb8   : > { %s3225_s9 = sld [smem:[#allocation30_spill]]  ;;  %s3226_s30 = sld [smem:[#allocation31_spill]] }
  0xb9   : > { %s3227_s6 = sld [smem:[#allocation34_spill]]  ;;  %s3228_s14 = sld [smem:[#allocation36_spill]] }
  0xbd   : > { %p550_p10 = scmp.lt.s32.totalorder %s3223_s24, 1  ;;  %p1846_p7 = scmp.ne.s32.totalorder %s3223_s24, 0 }
  0xbe   : > { %v579_v0 = vld [vmem:[%s449_s8] sm:$0xff] (!%p1846_p7)  ;;  %vm580_vm0 = vcmask (!%p1846_p7), 261120  }
  0xbf   : > { %s551_s25 = scalar_select %p550_p10, %s3223_s24, 1 }
  0xc0   : > { %578 = sbr.rel (%p1846_p7) target bundleno = 199 (0xc7), region = 76  ;;  %581 = vst.msk [vmem:[#allocation2] sm:$0xff] (!%p1846_p7), %vm580_vm0, %v579_v0 }
  0xc1   : > { %s1886_s1 = sshll.u32 %s551_s25, 4  ;;  %s1889_s26 = sshll.u32 %s551_s25, 5 }
  0xc2   : > { %s554_s15 = scalar_lea.vmem %s3224_s28, %s1886_s1  ;;  %s2882_s23 = scalar_lea.vmem %s3225_s9, %s1886_s1 }
  0xc3   : > { %s2887_s21 = scalar_lea.vmem %s3226_s30, %s1886_s1  ;;  %s2892_s0 = scalar_lea.vmem %s3227_s6, %s1889_s26 }
  0xc4   : > { %s1845_s5 = sshll.u32 %s551_s25, 3  ;;  %s2899_s28 = scalar_lea.vmem [#allocation11], %s1832_s17 }
  0xc5   : > { %s2897_s27 = scalar_lea.vmem %s3228_s14, %s1845_s5 }
  0xc7 PF: > { %v2178_v1 = vld [vmem:[%s554_s15] sm:$0xff]   ;;  %v2474_v2 = vmov 0.0   ;;  %v2179_v3 = vld [vmem:[%s554_s15 + $0x8] sm:$0xff]   ;;  %vm2475_vm1 = vmmov 0   ;;  %vm601_vm2 = vcmask 261120   ;;  %v645_v6 = vlaneseq  ;;  %s2476_s5 = smov 96  }
  0xc8   : > { %1929 = vmatprep.subr.bf16.mxu0 %v2474_v2  ;;  %1951 = vmatprep.subr.bf16.mxu1 %v2474_v2  ;;  %v582_v4 = vld [vmem:[#allocation2] sm:$0xff]  ;;  %s2477_s7 = smov 64   ;;  %v2181_v32 = vld [vmem:[%s2882_s23 + $0x8] sm:$0xff]   ;;  %s2478_s13 = smov 112   ;;  %vm776_vm5 = vcmask 64512   ;;  %vm1023_vm6 = vcmask 1043456  }
  0xc9   : > { %1930 = vmatpush3.bf16.msra.mxu0 %v2178_v1  ;;  %1933 = vmatprep.mubr.msk.bf16.mxu0 %vm2475_vm1, %v2474_v2  ;;  %v584_v5 = vpack.c.bf16 %v582_v4, %v582_v4  ;;  %v2913_v7 = vshrl.u32 %v645_v6, 7  ;;  %v2921_v17 = vld [vmem:[%s2897_s27] sm:$0xff]  ;;  %s2479_s17 = smov 120   ;;  %s2480_s8 = smov 104   ;;  %vm1224_vm7 = vcmask 130048   ;;  %vm1226_vm8 = vcmask 195584  }
  0xca   : > { %1931 = vmatprep.subr.bf16.mxu0 %v2474_v2  ;;  %1953 = vmatprep.mubr.msk.bf16.mxu1 %vm2475_vm1, %v2474_v2  ;;  %v2180_v31 = vld [vmem:[%s2882_s23] sm:$0xff]   ;;  %s2481_s6 = smov 8   ;;  %s2482_s20 = smov 16   ;;  %vm1479_vm9 = vcmask 523264  }
  0xcb   : > { %vm654_vm3 = vcmp.eq.s32.totalorder %v2913_v7, 7  ;;  %vm647_vm4 = vcmp.eq.s32.totalorder %v2913_v7, 0  ;;  %v672_v15 = vsub.s32 0, %v2913_v7  ;;  %v691_v36 = vsub.s32 1, %v2913_v7  ;;  %s2483_s30 = smov 24   ;;  %s3229_s24 = scalar_lea.vmem [#allocation6], %s2861_s3 }
  0xcc   : > { %v696_v37 = vsub.s32 2, %v2913_v7  ;;  %s3230_s25 = smov %s3229_s24  ;;  %s3231_s1 = scalar_lea.vmem [#allocation8], %s2861_s3 }
  0xcd   : > { %1932 = vmatpush3.bf16.msra.mxu0 %v2179_v3  ;;  %v673_v20 = vrot.slane %v2921_v17, %v672_v15  ;;  %v692_v38 = vrot.slane %v2921_v17, %v691_v36  ;;  %s3232_s26 = smov %s3231_s1 }
  0xce   : > { %1937 = vmatprep.subr.bf16.mxu0 %v2474_v2  ;;  %v697_v41 = vrot.slane %v2921_v17, %v696_v37 }
  0xd0   : > { %1934 = vmatmul.mubr.msk.bf16.vlgmr.msra.gmra.mrb[0].mxu0 %vm601_vm2, %v584_v5 }
  0xd1   : > { %1941 = vmatprep.mubr.msk.bf16.mxu0 %vm2475_vm1, %v2474_v2  ;;  %1938 = vmatpush3.bf16.msra.mxu0 %v2180_v31 }
  0xd2   : > { %1939 = vmatprep.subr.bf16.mxu0 %v2474_v2 }
  0xd5   : > { %1940 = vmatpush3.bf16.msra.mxu0 %v2181_v32 }
  0xd6   : > { %1945 = vmatprep.subr.bf16.mxu0 %v2474_v2 }
 0x1a3   : > { %v639_v8 = vpop.f32.mrb[0].mxu0 }
 0x1a4   : > { %v655_v9 = vrot.slane %v639_v8, 1  ;;  %660 = vrot.lane.b32.xlu0 %v639_v8, %s2476_s5  ;;  %v1935_v10 = vpop.f32.mrb[1].mxu0  ;;  %v649_v14 = vrot.slane %v639_v8, 7 }
 0x1a5   : > { %v642_v11 = vpop.f32.mrb[2].mxu0 }
 0x1a6   : > { %v1936_v12 = vpop.f32.mrb[3].mxu0  ;;  %v659_v13 = vsel %vm654_vm3, 0.0, %v655_v9  ;;  %v653_v19 = vsel %vm647_vm4, 0.0, %v649_v14 }
 0x1a8   : > { %666 = vrot.lane.b32.xlu0 %v659_v13, %s2477_s7 }
 0x216   : > { %v661_v16 = vpop.permute.xlu0 %660 }
 0x217   : > { %v663_v18 = vadd.f32 %v661_v16, %v582_v4 }
 0x219   : > { %v664_v21 = vadd.f32 %v663_v18, %v653_v19 }
 0x21a   : > { %v667_v22 = vpop.permute.xlu0 %666 }
 0x21b   : > { %v669_v23 = vadd.f32 %v667_v22, %v664_v21 }
 0x21d   : > { %v2924_v24 = vadd.f32 %v673_v20, %v669_v23 }
 0x21f   : > { %v675_v25 = vsel %vm601_vm2, %v2924_v24, 0.0 }
 0x220   : > { %676 = vadd.xlane.f32.xlu1 %v675_v25 }
 0x2ad   : > { %v677_v26 = vpop.xlane.xlu1 %676 }
 0x2ae   : > { %v679_v27 = vmul.f32 0.03125, %v677_v26 }
 0x2b0   : > { %v680_v28 = vsub.f32 %v2924_v24, %v679_v27 }
 0x2b2   : > { %v681_v29 = vmul.f32 %v680_v28, %v680_v28 }
 0x2b4   : > { %v682_v30 = vsel %vm601_vm2, %v681_v29, 0.0 }
 0x2b5   : > { %683 = vadd.xlane.f32.xlu1 %v682_v30 }
 0x342   : > { %v684_v33 = vpop.xlane.xlu1 %683 }
 0x343   : > { %v685_v34 = vmul.f32 0.03125, %v684_v33 }
 0x345   : > { %v686_v35 = vadd.f32 1e-05, %v685_v34 }
 0x347   : > { %2194 = vrsqrt.f32 %v686_v35 }
 0x351   : > { %v2195_v39 = vpop.eup %2194 }
 0x352   : > { %v688_v40 = vmul.f32 %v2195_v39, %v680_v28 }
 0x354   : > { %v693_v42 = vmul.f32 %v692_v38, %v688_v40 }
 0x356   : > { %v698_v43 = vadd.f32 %v697_v41, %v693_v42 }
 0x358   : > { %v699_v44 = vpack.c.bf16 %v698_v43, %v698_v43 }
 0x35a   : > { %1942 = vmatmul.mubr.msk.bf16.vlgmr.msra.gmra.mrb[4].mxu0 %vm601_vm2, %v699_v44 }
 0x35b   : > { %1947 = vmatprep.mubr.msk.bf16.mxu0 %vm2475_vm1, %v2474_v2 }
 0x42d   : > { %v753_v45 = vpop.f32.mrb[4].mxu0 }
 0x42e   : > { %763 = vrot.lane.b32.xlu1 %v753_v45, %s2478_s13  ;;  %760 = vrot.lane.b32.xlu0 %v753_v45, %s2479_s17  ;;  %v1943_v46 = vpop.f32.mrb[5].mxu0  ;;  %v769_v49 = vpack.c.bf16 %v753_v45, %v753_v45 }
 0x42f   : > { %v756_v47 = vpop.f32.mrb[6].mxu0 }
 0x430   : > { %v1944_v48 = vpop.f32.mrb[7].mxu0 }
 0x432   : > { %766 = vrot.lane.b32.xlu0 %v753_v45, %s2480_s8 }
 0x436   : > { %774 = vrot.lane.b32.xlu0 %v769_v49, %s2476_s5 }
 0x4a0   : > { %v761_v50 = vpop.permute.xlu0 %760  ;;  %v764_v52 = vpop.permute.xlu1 %763 }
 0x4a1   : > { %v2942_v51 = vpack.c.bf16 %v761_v50, %v761_v50  ;;  %v2946_v54 = vpack.c.bf16 %v764_v52, %v764_v52 }
 0x4a3   : > { %824 = vrot.lane.b32.xlu0 %v2942_v51, %s2476_s5 }
 0x4a4   : > { %v767_v53 = vpop.permute.xlu0 %766 }
 0x4a5   : > { %v2948_v55 = vpack.c.bf16 %v767_v53, %v767_v53 }
 0x4a7   : > { %922 = vrot.lane.b32.xlu1 %v2948_v55, %s2476_s5  ;;  %873 = vrot.lane.b32.xlu0 %v2946_v54, %s2476_s5 }
 0x4a8   : > { %v775_v56 = vpop.permute.xlu0 %774 }
 0x4a9   : > { %v781_v57 = vsel %vm776_vm5, %v775_v56, 0 }
 0x4aa   : > { %1946 = vmatpush3.bf16.xpose.msra.mxu0 %v781_v57 }
 0x4ab   : > { %1957 = vmatprep.subr.bf16.mxu0 %v2474_v2 }
 0x4b1   : > { %1948 = vmatmul.mubr.msk.bf16.vlgmr.msra.gmra.mrb[8].mxu0 %vm776_vm5, %v769_v49 }
 0x4b2   : > { %1959 = vmatprep.mubr.msk.bf16.mxu0 %vm2475_vm1, %v2474_v2 }
 0x515   : > { %v825_v58 = vpop.permute.xlu0 %824 }
 0x516   : > { %v830_v59 = vsel %vm776_vm5, %v825_v58, 0 }
 0x517   : > { %1952 = vmatpush3.bf16.xpose.msra.mxu1 %v830_v59 }
 0x518   : > { %1963 = vmatprep.subr.bf16.mxu1 %v2474_v2 }
 0x519   : > { %v874_v60 = vpop.permute.xlu0 %873  ;;  %v923_v62 = vpop.permute.xlu1 %922 }
 0x51a   : > { %v879_v61 = vsel %vm776_vm5, %v874_v60, 0  ;;  %v928_v63 = vsel %vm776_vm5, %v923_v62, 0 }
 0x51b   : > { %1958 = vmatpush3.bf16.xpose.msra.mxu0 %v879_v61 }
 0x51c   : > { %1969 = vmatprep.subr.bf16.mxu0 %v2474_v2 }
 0x51e   : > { %1954 = vmatmul.mubr.msk.bf16.vlgmr.msra.gmra.mrb[0].mxu1 %vm776_vm5, %v2942_v51 }
 0x51f   : > { %1964 = vmatpush3.bf16.xpose.msra.mxu1 %v928_v63  ;;  %1965 = vmatprep.mubr.msk.bf16.mxu1 %vm2475_vm1, %v2474_v2 }
 0x520   : > { %1975 = vmatprep.subr.bf16.mxu1 %v2474_v2 }
 0x522   : > { %1960 = vmatmul.mubr.msk.bf16.vlgmr.msra.gmra.mrb[12].mxu0 %vm776_vm5, %v2946_v54 }
 0x523   : > { %1971 = vmatprep.mubr.msk.bf16.mxu0 %vm2475_vm1, %v2474_v2 }
 0x526   : > { %1966 = vmatmul.mubr.msk.bf16.vlgmr.msra.gmra.mrb[4].mxu1 %vm776_vm5, %v2948_v55 }
 0x527   : > { %1977 = vmatprep.mubr.msk.bf16.mxu1 %vm2475_vm1, %v2474_v2 }
 0x584   : > { %v817_v0 = vpop.f32.mrb[8].mxu0 }
 0x585   : > { %v1949_v1 = vpop.f32.mrb[9].mxu0  ;;  %v970_v3 = vsel %vm776_vm5, %v817_v0, -inf }
 0x586   : > { %971 = vmax.xlane.f32.xlu0 %v970_v3  ;;  %v820_v4 = vpop.f32.mrb[10].mxu0 }
 0x587   : > { %v1950_v5 = vpop.f32.mrb[11].mxu0 }
 0x5f1   : > { %v866_v6 = vpop.f32.mrb[0].mxu1 }
 0x5f2   : > { %v1955_v8 = vpop.f32.mrb[1].mxu1  ;;  %v973_v9 = vsel %vm776_vm5, %v866_v6, -inf }
 0x5f3   : > { %974 = vmax.xlane.f32.xlu1 %v973_v9  ;;  %v869_v10 = vpop.f32.mrb[2].mxu1 }
 0x5f4   : > { %v1956_v11 = vpop.f32.mrb[3].mxu1  ;;  %v2182_v10 = vld [vmem:[%s2887_s21] sm:$0xff]  }
 0x5f5   : > { %v915_v12 = vpop.f32.mrb[12].mxu0  ;;  %v2183_v11 = vld [vmem:[%s2887_s21 + $0x8] sm:$0xff]  }
 0x5f6   : > { %v1961_v13 = vpop.f32.mrb[13].mxu0  ;;  %v976_v14 = vsel %vm776_vm5, %v915_v12, -inf }
 0x5f7   : > { %977 = vmax.xlane.f32.xlu0 %v976_v14  ;;  %v918_v15 = vpop.f32.mrb[14].mxu0 }
 0x5f8   : > { %v1962_v16 = vpop.f32.mrb[15].mxu0 }
 0x5f9   : > { %v964_v18 = vpop.f32.mrb[4].mxu1 }
 0x5fa   : > { %v1967_v19 = vpop.f32.mrb[5].mxu1  ;;  %v979_v20 = vsel %vm776_vm5, %v964_v18, -inf }
 0x5fb   : > { %v967_v21 = vpop.f32.mrb[6].mxu1  ;;  %980 = vmax.xlane.f32.xlu0 %v979_v20 }
 0x5fc   : > { %v1968_v22 = vpop.f32.mrb[7].mxu1 }
 0x604   : > { %1018 = vrot.lane.b32.xlu1 %v769_v49, %s2477_s7 }
 0x613   : > { %v972_v23 = vpop.xlane.xlu0 %971 }
 0x614   : > { %v982_v25 = vsub.f32 %v817_v0, %v972_v23 }
 0x616   : > { %v986_v26 = vmul.f32 1.442695, %v982_v25 }
 0x618   : > { %2196 = vpow2.f32 %v986_v26 }
 0x622   : > { %v2197_v27 = vpop.eup %2196 }
 0x623   : > { %v994_v28 = vsel %vm776_vm5, %v2197_v27, 0.0 }
 0x628   : > { %995 = vadd.xlane.f32.xlu1 %v994_v28 }
 0x680   : > { %v975_v29 = vpop.xlane.xlu1 %974 }
 0x681   : > { %v983_v30 = vsub.f32 %v866_v6, %v975_v29 }
 0x683   : > { %v988_v31 = vmul.f32 1.442695, %v983_v30 }
 0x684   : > { %v1019_v32 = vpop.permute.xlu1 %1018  ;;  %v978_v33 = vpop.xlane.xlu0 %977 }
 0x685   : > { %2198 = vpow2.f32 %v988_v31  ;;  %v1025_v34 = vsel %vm1023_vm6, %v1019_v32, 0  ;;  %v984_v35 = vsub.f32 %v915_v12, %v978_v33  ;;  %v2184_v32 = vld [vmem:[%s3229_s24] sm:$0xff]  }
 0x686   : > { %1970 = vmatpush3.bf16.msra.mxu0 %v1025_v34  ;;  %v2185_v34 = vld [vmem:[%s3230_s25 + $0x8] sm:$0xff]  }
 0x687   : > { %v990_v36 = vmul.f32 1.442695, %v984_v35  ;;  %1981 = vmatprep.subr.bf16.mxu0 %v2474_v2  ;;  %v1293_v35 = vpack.c.bf16 %v2924_v24, %v2924_v24 }
 0x688   : > { %v981_v37 = vpop.xlane.xlu0 %980 }
 0x689   : > { %2200 = vpow2.f32 %v990_v36  ;;  %v985_v38 = vsub.f32 %v964_v18, %v981_v37  ;;  %v1290_v36 = vsub.s32 3, %v2913_v7  ;;  %v1283_v37 = vadd.f32 nan, %v2924_v24 }
 0x68b   : > { %v992_v39 = vmul.f32 1.442695, %v985_v38  ;;  %v1291_v38 = vrot.slane %v2921_v17, %v1290_v36 }
 0x68d   : > { %2202 = vpow2.f32 %v992_v39  ;;  %v1292_v39 = vadd.f32 %v1291_v38, %v1283_v37 }
 0x68f   : > { %v2199_v40 = vpop.eup %2198 }
 0x690   : > { %v997_v41 = vsel %vm776_vm5, %v2199_v40, 0.0 }
 0x691   : > { %998 = vadd.xlane.f32.xlu0 %v997_v41 }
 0x693   : > { %v2201_v42 = vpop.eup %2200 }
 0x694   : > { %v1000_v43 = vsel %vm776_vm5, %v2201_v42, 0.0 }
 0x695   : > { %1001 = vadd.xlane.f32.xlu1 %v1000_v43 }
 0x697   : > { %v2203_v44 = vpop.eup %2202 }
 0x698   : > { %v1003_v45 = vsel %vm776_vm5, %v2203_v44, 0.0 }
 0x699   : > { %1004 = vadd.xlane.f32.xlu0 %v1003_v45 }
 0x6a6   : > { %1115 = vrot.lane.b32.xlu1 %v2946_v54, %s2477_s7 }
 0x6aa   : > { %1163 = vrot.lane.b32.xlu1 %v2948_v55, %s2477_s7 }
 0x6af   : > { %1067 = vrot.lane.b32.xlu0 %v2942_v51, %s2477_s7 }
 0x6b5   : > { %v996_v46 = vpop.xlane.xlu1 %995 }
 0x6b6   : > { %2204 = vrcp.f32 %v996_v46 }
 0x6c0   : > { %v2205_v47 = vpop.eup %2204 }
 0x6c1   : > { %v1010_v48 = vmul.f32 %v2205_v47, %v2197_v27 }
 0x6c3   : > { %v1014_v49 = vpack.c.bf16 %v1010_v48, %v1010_v48 }
 0x6c5   : > { %1972 = vmatmul.mubr.msk.bf16.vlgmr.msra.gmra.mrb[16].mxu0 %vm776_vm5, %v1014_v49 }
 0x6c6   : > { %1983 = vmatprep.mubr.msk.bf16.mxu0 %vm2475_vm1, %v2474_v2 }
 0x71e   : > { %v999_v50 = vpop.xlane.xlu0 %998 }
 0x71f   : > { %2206 = vrcp.f32 %v999_v50 }
 0x722   : > { %v1002_v52 = vpop.xlane.xlu1 %1001 }
 0x723   : > { %2208 = vrcp.f32 %v1002_v52 }
 0x726   : > { %v1116_v53 = vpop.permute.xlu1 %1115  ;;  %v1005_v54 = vpop.xlane.xlu0 %1004 }
 0x727   : > { %v1121_v55 = vsel %vm1023_vm6, %v1116_v53, 0  ;;  %2210 = vrcp.f32 %v1005_v54  ;;  %v2186_v53 = vld [vmem:[%s3231_s1] sm:$0xff]  }
 0x728   : > { %1982 = vmatpush3.bf16.msra.mxu0 %v1121_v55  ;;  %v2187_v54 = vld [vmem:[%s3232_s26 + $0x8] sm:$0xff]  }
 0x729   : > { %v2207_v51 = vpop.eup %2206  ;;  %1993 = vmatprep.subr.bf16.mxu0 %v2474_v2 }
 0x72a   : > { %v1011_v56 = vmul.f32 %v2207_v51, %v2199_v40  ;;  %v1068_v57 = vpop.permute.xlu0 %1067  ;;  %v1164_v59 = vpop.permute.xlu1 %1163  ;;  %v2037_v40 = vadd.f32 %v1291_v38, %v2924_v24 }
 0x72b   : > { %v1073_v58 = vsel %vm1023_vm6, %v1068_v57, 0  ;;  %v1169_v63 = vsel %vm1023_vm6, %v1164_v59, 0  ;;  %v1369_v57 = vsub.s32 4, %v2913_v7 }
 0x72c   : > { %1976 = vmatpush3.bf16.msra.mxu1 %v1073_v58  ;;  %v1015_v60 = vpack.c.bf16 %v1011_v56, %v1011_v56  ;;  %v1374_v58 = vsub.s32 5, %v2913_v7 }
 0x72d   : > { %v2209_v61 = vpop.eup %2208  ;;  %1987 = vmatprep.subr.bf16.mxu1 %v2474_v2  ;;  %v1370_v59 = vrot.slane %v2921_v17, %v1369_v57 }
 0x72e   : > { %v1012_v62 = vmul.f32 %v2209_v61, %v2201_v42 }
 0x72f   : > { %1978 = vmatmul.mubr.msk.bf16.vlgmr.msra.gmra.mrb[8].mxu1 %vm776_vm5, %v1015_v60 }
 0x730   : > { %1988 = vmatpush3.bf16.msra.mxu1 %v1169_v63  ;;  %v1016_v0 = vpack.c.bf16 %v1012_v62, %v1012_v62  ;;  %1989 = vmatprep.mubr.msk.bf16.mxu1 %vm2475_vm1, %v2474_v2  ;;  %v1375_v62 = vrot.slane %v2921_v17, %v1374_v58 }
 0x731   : > { %v2211_v1 = vpop.eup %2210  ;;  %2009 = vmatprep.subr.bf16.mxu1 %v2474_v2 }
 0x732   : > { %v1013_v3 = vmul.f32 %v2211_v1, %v2203_v44  ;;  %1984 = vmatmul.mubr.msk.bf16.vlgmr.msra.gmra.mrb[20].mxu0 %vm776_vm5, %v1016_v0 }
 0x733   : > { %1997 = vmatprep.mubr.msk.bf16.mxu0 %vm2475_vm1, %v2474_v2  ;;  %1994 = vmatpush3.bf16.msra.mxu0 %v2182_v10 }
 0x734   : > { %v1017_v4 = vpack.c.bf16 %v1013_v3, %v1013_v3  ;;  %1995 = vmatprep.subr.bf16.mxu0 %v2474_v2  ;;  %v2188_v3 = vld [vmem:[%s2892_s0] sm:$0xff]  }
 0x737   : > { %1990 = vmatmul.mubr.msk.bf16.vlgmr.msra.gmra.mrb[12].mxu1 %vm776_vm5, %v1017_v4  ;;  %1996 = vmatpush3.bf16.msra.mxu0 %v2183_v11  ;;  %v2189_v4 = vld [vmem:[%s2892_s0 + $0x8] sm:$0xff]  }
 0x738   : > { %2013 = vmatprep.mubr.msk.bf16.mxu1 %vm2475_vm1, %v2474_v2  ;;  %2001 = vmatprep.subr.bf16.mxu0 %v2474_v2 }
 0x739   : > { %2010 = vmatpush3.bf16.msra.mxu1 %v2186_v53 }
 0x73a   : > { %2011 = vmatprep.subr.bf16.mxu1 %v2474_v2 }
 0x73d   : > { %2012 = vmatpush3.bf16.msra.mxu1 %v2187_v54 }
 0x73e   : > { %2017 = vmatprep.subr.bf16.mxu1 %v2474_v2 }
 0x798   : > { %v1061_v5 = vpop.f32.mrb[16].mxu0 }
 0x799   : > { %v1973_v6 = vpop.f32.mrb[17].mxu0 }
 0x79a   : > { %v1064_v8 = vpop.f32.mrb[18].mxu0  ;;  %v2191_v6 = vld [vmem:[%s2892_s0 + $0x18] sm:$0xff]  }
 0x79b   : > { %v1974_v9 = vpop.f32.mrb[19].mxu0  ;;  %v1384_v8 = vsub.s32 6, %v2913_v7 }
 0x79d   : > { %v1385_v9 = vrot.slane %v2921_v17, %v1384_v8 }
 0x802   : > { %v1109_v12 = vpop.f32.mrb[8].mxu1 }
 0x803   : > { %1212 = vrot.lane.b32.xlu0 %v1109_v12, %s2481_s6  ;;  %v1979_v13 = vpop.f32.mrb[9].mxu1 }
 0x804   : > { %v1112_v14 = vpop.f32.mrb[10].mxu1 }
 0x805   : > { %v1980_v15 = vpop.f32.mrb[11].mxu1  ;;  %v1157_v16 = vpop.f32.mrb[20].mxu0 }
 0x806   : > { %1216 = vrot.lane.b32.xlu1 %v1157_v16, %s2482_s20  ;;  %v1985_v18 = vpop.f32.mrb[21].mxu0 }
 0x807   : > { %v1160_v19 = vpop.f32.mrb[22].mxu0 }
 0x808   : > { %v1986_v20 = vpop.f32.mrb[23].mxu0 }
 0x80a   : > { %v1205_v21 = vpop.f32.mrb[12].mxu1 }
 0x80b   : > { %1220 = vrot.lane.b32.xlu0 %v1205_v21, %s2483_s30  ;;  %v1991_v22 = vpop.f32.mrb[13].mxu1 }
 0x80c   : > { %v1208_v23 = vpop.f32.mrb[14].mxu1 }
 0x80d   : > { %v1992_v25 = vpop.f32.mrb[15].mxu1 }
 0x875   : > { %v1213_v26 = vpop.permute.xlu0 %1212 }
 0x876   : > { %v1223_v28 = vsel %vm776_vm5, %v1061_v5, %v1213_v26  ;;  %v2190_v5 = vld [vmem:[%s2892_s0 + $0x10] sm:$0xff]   ;;  %s3233_s0 = scalar_lea.vmem [#allocation9], %s2861_s3  ;;  %v1525_v26 = vsub.s32 7, %v2913_v7  ;;  %s3235_s3 = sld [smem:[#allocation18_spill]] }
 0x877   : > { %v2192_v21 = vld [vmem:[%s3233_s0] sm:$0xff]   ;;  %s3234_s15 = smov %s3233_s0 }
 0x878   : > { %v1217_v27 = vpop.permute.xlu1 %1216  ;;  %v2193_v23 = vld [vmem:[%s3234_s15 + $0x8] sm:$0xff]  }
 0x879   : > { %v1225_v29 = vsel %vm1224_vm7, %v1223_v28, %v1217_v27  ;;  %v1526_v27 = vrot.slane %v2921_v17, %v1525_v26 }
 0x87c   : > { %p1878_p8 = scmp.ne.s32.totalorder %s3235_s3, 1 }
 0x87d   : > { %v1221_v30 = vpop.permute.xlu0 %1220 }
 0x87e   : > { %v1227_v31 = vsel %vm1226_vm8, %v1225_v29, %v1221_v30 }
 0x87f   : > { %v1228_v33 = vpack.c.bf16 %v1227_v31, %v1227_v31 }
 0x881   : > { %1998 = vmatmul.mubr.msk.bf16.vlgmr.msra.gmra.mrb[24].mxu0 %vm601_vm2, %v1228_v33 }
 0x882   : > { %2002 = vmatpush3.bf16.msra.mxu0 %v2184_v32  ;;  %2005 = vmatprep.mubr.msk.bf16.mxu0 %vm2475_vm1, %v2474_v2 }
 0x883   : > { %2003 = vmatprep.subr.bf16.mxu0 %v2474_v2 }
 0x886   : > { %2004 = vmatpush3.bf16.msra.mxu0 %v2185_v34 }
 0x88d   : > { %2006 = vmatmul.mubr.msk.bf16.vlgmr.msra.gmra.mrb[24].mxu0 %vm601_vm2, %v1293_v35 }
 0x960   : > { %v1347_v41 = vpop.f32.mrb[24].mxu0 }
 0x961   : > { %v3032_v42 = vadd.f32 %v1347_v41, %v1292_v39  ;;  %v3034_v43 = vadd.f32 %v2037_v40, %v1347_v41  ;;  %v2007_v44 = vpop.f32.mrb[25].mxu0 }
 0x962   : > { %v1350_v45 = vpop.f32.mrb[26].mxu0 }
 0x963   : > { %v2008_v46 = vpop.f32.mrb[27].mxu0  ;;  %v1354_v47 = vsel %vm601_vm2, %v3034_v43, 0.0  ;;  %v1528_v25 = vpack.c.bf16 %v3034_v43, %v3034_v43  ;;  %v2039_v28 = vadd.f32 %v1526_v27, %v3032_v42 }
 0x964   : > { %1355 = vadd.xlane.f32.xlu1 %v1354_v47 }
 0x9f1   : > { %v1356_v48 = vpop.xlane.xlu1 %1355 }
 0x9f2   : > { %v1357_v49 = vmul.f32 0.03125, %v1356_v48 }
 0x9f4   : > { %v1358_v50 = vsub.f32 %v3034_v43, %v1357_v49 }
 0x9f6   : > { %v1359_v52 = vmul.f32 %v1358_v50, %v1358_v50 }
 0x9f8   : > { %v1360_v24 = vsel %vm601_vm2, %v1359_v52, 0.0 }
 0x9f9   : > { %1361 = vadd.xlane.f32.xlu0 %v1360_v24 }
 0xa86   : > { %v1362_v55 = vpop.xlane.xlu0 %1361 }
 0xa87   : > { %v1363_v51 = vmul.f32 0.03125, %v1362_v55 }
 0xa89   : > { %v1364_v56 = vadd.f32 1e-05, %v1363_v51 }
 0xa8b   : > { %2212 = vrsqrt.f32 %v1364_v56 }
 0xa95   : > { %v2213_v60 = vpop.eup %2212 }
 0xa96   : > { %v1366_v61 = vmul.f32 %v2213_v60, %v1358_v50 }
 0xa98   : > { %v1371_v63 = vmul.f32 %v1370_v59, %v1366_v61 }
 0xa9a   : > { %v1376_v0 = vadd.f32 %v1375_v62, %v1371_v63 }
 0xa9c   : > { %v1377_v1 = vpack.c.bf16 %v1376_v0, %v1376_v0 }
 0xa9e   : > { %2014 = vmatmul.mubr.msk.bf16.vlgmr.msra.gmra.mrb[16].mxu1 %vm601_vm2, %v1377_v1 }
 0xa9f   : > { %2025 = vmatprep.mubr.msk.bf16.mxu1 %vm2475_vm1, %v2474_v2  ;;  %2018 = vmatpush3.bf16.msra.mxu1 %v2188_v3 }
 0xaa0   : > { %2019 = vmatprep.subr.bf16.mxu1 %v2474_v2 }
 0xaa3   : > { %2020 = vmatpush3.bf16.msra.mxu1 %v2189_v4 }
 0xaa4   : > { %2021 = vmatprep.subr.bf16.mxu1 %v2474_v2 }
 0xaa7   : > { %2022 = vmatpush3.bf16.msra.mxu1 %v2190_v5 }
 0xaa8   : > { %2023 = vmatprep.subr.bf16.mxu1 %v2474_v2 }
 0xaab   : > { %2024 = vmatpush3.bf16.msra.mxu1 %v2191_v6 }
 0xaac   : > { %2029 = vmatprep.subr.bf16.mxu1 %v2474_v2 }
 0xb71   : > { %v1435_v10 = vpop.f32.mrb[16].mxu1 }
 0xb72   : > { %v1436_v11 = vadd.f32 %v1435_v10, %v1385_v9  ;;  %v2015_v12 = vpop.f32.mrb[17].mxu1 }
 0xb73   : > { %v1438_v13 = vpop.f32.mrb[18].mxu1 }
 0xb74   : > { %v1442_v14 = vmul.f32 0.70710677, %v1436_v11  ;;  %v2016_v15 = vpop.f32.mrb[19].mxu1  ;;  %v1441_v18 = vmul.f32 0.5, %v1436_v11 }
 0xb76   : > { %2214 = verf.f32 %v1442_v14 }
 0xb80   : > { %v2215_v16 = vpop.eup %2214 }
 0xb81   : > { %v1444_v19 = vadd.f32 1.0, %v2215_v16 }
 0xb83   : > { %v1445_v20 = vmul.f32 %v1444_v19, %v1441_v18 }
 0xb85   : > { %v1446_v22 = vpack.c.bf16 %v1445_v20, %v1445_v20 }
 0xb87   : > { %2026 = vmatmul.mubr.msk.bf16.vlgmr.msra.gmra.mrb[20].mxu1 %vm1479_vm9, %v1446_v22 }
 0xb88   : > { %2030 = vmatpush3.bf16.msra.mxu1 %v2192_v21  ;;  %2033 = vmatprep.mubr.msk.bf16.mxu1 %vm2475_vm1, %v2474_v2 }
 0xb89   : > { %2031 = vmatprep.subr.bf16.mxu1 %v2474_v2 }
 0xb8c   : > { %2032 = vmatpush3.bf16.msra.mxu1 %v2193_v23 }
 0xb93   : > { %2034 = vmatmul.mubr.msk.bf16.vlgmr.msra.gmra.mrb[20].mxu1 %vm601_vm2, %v1528_v25 }
 0xc63   : > { %1593 = sbr.rel (%p1878_p8) target bundleno = 3178 (0xc6a), region = 80 }
 0xc66   : > { %v1582_v29 = vpop.f32.mrb[20].mxu1 }
 0xc67   : > { %v2040_v30 = vadd.f32 %v2039_v28, %v1582_v29  ;;  %v2035_v31 = vpop.f32.mrb[21].mxu1 }
 0xc68   : > { %v1585_v32 = vpop.f32.mrb[22].mxu1 }
 0xc69   : > { %1589 = vst.msk [vmem:[#allocation2] sm:$0xff] %vm601_vm2, %v2040_v30  ;;  %v2036_v33 = vpop.f32.mrb[23].mxu1  ;;  %1594 = vst.msk [vmem:[%s2899_s28] sm:$0xff] (!%p1878_p8), %vm601_vm2, %v2040_v30 }
 0xc6a PF: > { %s3236_s2 = sld [smem:[#allocation19_spill]]  ;;  %s3237_s16 = sld [smem:[#allocation25_spill]] }
 0xc6b   : > { %s3238_s4 = sld [smem:[#allocation37_spill]]  ;;  %s1609_s18 = sshll.u32 %s2899_s28, 4  ;;  %s1610_s18 = int_to_ptr.vmem [resolvable:$true] %s1609_s18 }
 0xc6c   : > { %s1596_s14 = scalar_lea.sflag [#allocation5], %s2851_s29  ;;  %s2336_s27 = scalar_lea.vmem %s1610_s18, 128 }
 0xc6d   : > { %p2337_p4 = scmp.ne.s32.totalorder %s1610_s18, %s2336_s27  ;;  %s2484_s5 = smov [#allocation11]  }
 0xc6e   : > { %s2340_s7 = sshll.u32 %s2484_s5, 4  ;;  %s2341_s7 = int_to_ptr.vmem [resolvable:$false] %s2340_s7 }
 0xc6f   : > { %s2342_s13 = scalar_lea.vmem %s2341_s7, 256  ;;  %p2343_p12 = scmp.lt.s32.totalorder %s1610_s18, %s2341_s7 }
 0xc70   : > { %s1880_s9 = sshll.u32 %s3236_s2, 7  ;;  %p3239_p0 = scmp.ne.s32.totalorder %s3237_s16, 0 }
 0xc71   : > { %s3084_s21 = scalar_lea.hbm %s3238_s4, %s1880_s9  ;;  %p2344_p1 = scmp.lt.s32.totalorder %s2342_s13, %s2336_s27 }
 0xc72   : > { %p2338_p6 = pnand %p2337_p4, %p3239_p0 }
 0xc73   : > { %p2345_p11 = por %p2344_p1, %p2343_p12 }
 0xc74   : > { %p2339_p3 = pneg %p2338_p6 }
 0xc76   : > { %p2346_p2 = pnand %p2345_p11, %p2339_p3 }
 0xc78   : > { %2349 = shalt.err (!%p2346_p2)
}
 0xc79   : > { %s2350_s29 = scalar_lea.hbm %s3084_s21, 128  ;;  %s2354_s8 = scalar_lea.hbm %s3238_s4, 256 }
 0xc7a   : > { %p2351_p9 = scmp.ne.s32.totalorder %s3084_s21, %s2350_s29  ;;  %p2355_p10 = scmp.lt.u32.totalorder %s3084_s21, %s3238_s4 }
 0xc7b   : > { %p2356_p7 = scmp.lt.u32.totalorder %s2354_s8, %s2350_s29  ;;  %p2358_p4 = scmp.lt.u32.totalorder %s2350_s29, %s3084_s21 }
 0xc7c   : > { %p2352_p5 = pnand %p2351_p9, %p3239_p0 }
 0xc7d   : > { %p2357_p8 = por %p2356_p7, %p2355_p10 }
 0xc7e   : > { %p2353_p13 = pneg %p2352_p5 }
 0xc7f   : > { %p2359_p6 = por %p2358_p4, %p2357_p8 }
 0xc81   : > { %p2360_p3 = pnand %p2359_p6, %p2353_p13 }
 0xc83   : > { %2363 = shalt.err (!%p2360_p3)
}
 0xc84   : > { %2057 = dma.vmem_to_hbm [thread:$0]  (%p3239_p0), %s1610_s18, 128, %s3084_s21, %s1596_s14  }
 0xc85 PF: > { %s3240_s30 = sld [smem:[#allocation27_spill]]  ;;  %p2077_p12 = scmp.ge.s32.totalorder %s2466_s19, 2 }
 0xc86   : > { %s1621_s24 = sand.u32 1, %s2438_s12  }
 0xc87   : > { %s1622_s25 = scalar_lea.sflag [#allocation5], %s1621_s24 }
 0xc8b   : > { %p3241_p1 = scmp.ne.s32.totalorder %s3240_s30, 0 }
 0xc8d   : > { %p2073_p11 = pnand %p2077_p12, %p3241_p1 }
 0xc8f   : > { %2421 = dma.done.wait (!%p2073_p11), %s1622_s25, 128  }
 0xc90   : > { %2423 = vsyncadd (!%p2073_p11), %s1622_s25, 4294967168  ;;  %s31_s19 = sadd.s32 1, %s2466_s19   ;;  %s3242_s1 = sld [smem:[#allocation23_spill]] }
 0xc91   : > { %p28_p2 = scmp.ge.s32.totalorder %s31_s19, 6   ;;  %s3243_s12 = sld [smem:[#allocation16_spill]] }
 0xc92   : > { %s3244_s13 = sld [smem:[#allocation17_spill]]  ;;  %s3245_s14 = sld [smem:[#allocation26_spill]] }
 0xc93   : > { %s3246_s15 = sld [smem:[#allocation20_spill]]  ;;  %s3247_s16 = sld [smem:[#allocation21_spill]] }
 0xc94   : > { %s3248_s17 = sld [smem:[#allocation22_spill]]  ;;  %s3249_s18 = sld [smem:[#allocation24_spill]] }
 0xc95   : > { %s3250_s30 = smov %s2430_s10  ;;  %s3251_s10 = smov %s2434_s11 }
 0xc96   : > { %s3252_s11 = smov %s3242_s1  ;;  %30 = sbr.rel (!%p28_p2) target bundleno = 24 (0x18), region = 161 }
 0xc9d   :  { %1627 = vsyncpa [#allocation4], 1 }
 0xc9e   :  { %1629 = vsyncpa [#allocation4 + $0x1], 1 }
 0xc9f   :  { %1630 = vsyncpa [#allocation7], 1 }
 0xca0   :  { %1632 = vsyncpa [#allocation7 + $0x1], 1 }
 0xca1   :  { %1633 = vsyncpa [#allocation10], 1 }
 0xca2   :  { %1635 = vsyncpa [#allocation10 + $0x1], 1 }
 0xca3   :  { %1636 = vsyncpa [#allocation5], 1 }
 0xca4   :  { %1638 = vsyncpa [#allocation5 + $0x1], 1 }

</bundles_post_ra>
